<compile_context>
chip_gen: v7x
topology: tpu7x:2x2x1
jax: 0.10.0
libtpu: 0.0.40
codegen_flags: <defaults>
</compile_context>

<pallas_src>
import numpy as np

import jax
import jax.numpy as jnp
from jax.experimental import pallas as pl
from jax.experimental.pallas import tpu as pltpu


def _round_up(a, m):
    return ((a + m - 1) // m) * m


# ----------------------------------------------------------------------------
# Fused forward kernel (one batch tile per grid step)
# ----------------------------------------------------------------------------
def _fused_net_kernel(x_ref, c1w_ref, c1b_ref, c2w_ref, c2b_ref,
                      f1w_ref, f1b_ref, f2w_ref, f2b_ref, o_ref):
    bt = x_ref.shape[1]
    x = x_ref[...]                                          # [28(h), bt, 28(w)] f32

    # ---- conv1: ONE fused banded GEMM, K = (tap, w) = 140, N = 256 ----------
    # y1[(i,b), 128*parity + 10*jp + co] = conv1 output at row i, col 2*jp+parity
    lhs1 = jnp.concatenate([x[di:di + 24] for di in range(5)], axis=-1)
    lhs1 = lhs1.reshape(24 * bt, 5 * 28).astype(jnp.bfloat16)
    y1 = jnp.dot(lhs1, c1w_ref[...], preferred_element_type=jnp.float32)  # [24*bt,256]

    # ---- 2x2 maxpool + bias + ReLU ------------------------------------------
    # Even/odd output columns were emitted into vreg-aligned 128-lane halves,
    # so the column pool is a plain elementwise max (no lane rotation at all).
    pc = jnp.maximum(y1[:, :128], y1[:, 128:])              # [24*bt, 128]
    pr = pc.reshape(12, 2, bt, 128)
    h1 = jnp.maximum(jnp.maximum(pr[:, 0], pr[:, 1]) + c1b_ref[...], 0.0)  # [12,bt,128]
    # h1 lane layout: 10*jp + co  (jp<12, co<10); lanes 120..127 are exact zeros.

    # ---- conv2: 5 row-tap banded GEMMs with dense K = 128, N = 256 ----------
    y2 = None
    for di in range(5):
        lhs = h1[di:di + 8].reshape(8 * bt, 128).astype(jnp.bfloat16)
        t = jnp.dot(lhs, c2w_ref[di], preferred_element_type=jnp.float32)
        y2 = t if y2 is None else y2 + t                    # [8*bt, 256]
    # TODO(synk): Dropout2d after conv2 is identity in eval mode; training-mode
    # RNG masking is not implemented.

    # ---- 2x2 maxpool + bias + ReLU ------------------------------------------
    pc2 = jnp.maximum(y2[:, :128], y2[:, 128:])             # [8*bt, 128]
    pr2 = pc2.reshape(4, 2, bt, 128)
    h2 = jnp.maximum(jnp.maximum(pr2[:, 0], pr2[:, 1]) + c2b_ref[...], 0.0)  # [4,bt,128]
    # h2 lane layout: 20*ojp + co  (ojp<4, co<20); lanes 80..127 are exact zeros.

    # ---- fc1 (NCHW view(-1,320) folded into the weight packing), K = 512 ----
    hcat = jnp.concatenate([h2[0], h2[1], h2[2], h2[3]], axis=-1)  # [bt, 512]
    z1 = jnp.dot(hcat.astype(jnp.bfloat16), f1w_ref[...],
                 preferred_element_type=jnp.float32)
    z1 = jnp.maximum(z1 + f1b_ref[...], 0.0)                # [bt, 128], cols >= 50 are 0
    # TODO(synk): F.dropout before fc2 is identity in eval mode; not implemented.

    # ---- fc2 + masked log_softmax over the 10 real classes ------------------
    z2 = jnp.dot(z1.astype(jnp.bfloat16), f2w_ref[...],
                 preferred_element_type=jnp.float32) + f2b_ref[...]   # [bt, 128]
    lane = jax.lax.broadcasted_iota(jnp.int32, z2.shape, 1)
    logits = jnp.where(lane < 10, z2, -1e30)
    m = jnp.max(logits, axis=-1, keepdims=True)
    lse = m + jnp.log(jnp.sum(jnp.exp(logits - m), axis=-1, keepdims=True))
    o_ref[...] = (logits - lse).astype(o_ref.dtype)


# ----------------------------------------------------------------------------
# Host-side, one-time weight packing (hoisted out of the forward path)
# ----------------------------------------------------------------------------
def prepare_params(params):
    w1 = np.asarray(params["w1"], np.float32)      # [10, 1, 5, 5]
    b1 = np.asarray(params["b1"], np.float32)      # [10]
    w2 = np.asarray(params["w2"], np.float32)      # [20, 10, 5, 5]
    b2 = np.asarray(params["b2"], np.float32)      # [20]
    f1w = np.asarray(params["fc1_w"], np.float32)  # [50, 320]
    f1b = np.asarray(params["fc1_b"], np.float32)  # [50]
    f2w = np.asarray(params["fc2_w"], np.float32)  # [10, 50]
    f2b = np.asarray(params["fc2_b"], np.float32)  # [10]

    # conv1 fused-tap banded GEMM:
    #   K row    = 28*di + w
    #   N column = 128*parity + 10*jp + co   (output column j = 2*jp + parity)
    c1w = np.zeros((140, 256), np.float32)
    for parity in range(2):
        for jp in range(12):
            j = 2 * jp + parity
            col = 128 * parity + 10 * jp
            for di in range(5):
                for dj in range(5):
                    c1w[28 * di + j + dj, col:col + 10] = w1[:, 0, di, dj]
    c1b = np.zeros((1, 128), np.float32)
    for jp in range(12):
        c1b[0, 10 * jp:10 * jp + 10] = b1

    # conv2 row-tap banded GEMMs on the pooled conv1 map:
    #   K row    = 10*jp + ci                 (dense K = 128)
    #   N column = 128*parity + 20*ojp + co   (output column oj = 2*ojp + parity)
    c2w = np.zeros((5, 128, 256), np.float32)
    for di in range(5):
        for parity in range(2):
            for ojp in range(4):
                oj = 2 * ojp + parity
                col = 128 * parity + 20 * ojp
                for dj in range(5):
                    jp = oj + dj
                    c2w[di, 10 * jp:10 * jp + 10, col:col + 20] = w2[:, :, di, dj].T
    c2b = np.zeros((1, 128), np.float32)
    for ojp in range(4):
        c2b[0, 20 * ojp:20 * ojp + 20] = b2

    # fc1: fold the NCHW flatten (co*16 + oip*4 + ojp) into K = 128*oip + 20*ojp + co
    f1w_p = np.zeros((512, 128), np.float32)
    for oip in range(4):
        for ojp in range(4):
            for co in range(20):
                f1w_p[128 * oip + 20 * ojp + co, :50] = f1w[:, co * 16 + oip * 4 + ojp]
    f1b_p = np.zeros((1, 128), np.float32)
    f1b_p[0, :50] = f1b

    f2w_p = np.zeros((128, 128), np.float32)
    f2w_p[:50, :10] = f2w.T
    f2b_p = np.zeros((1, 128), np.float32)
    f2b_p[0, :10] = f2b

    return {
        "c1w": jnp.asarray(c1w, jnp.bfloat16), "c1b": jnp.asarray(c1b),
        "c2w": jnp.asarray(c2w, jnp.bfloat16), "c2b": jnp.asarray(c2b),
        "f1w": jnp.asarray(f1w_p, jnp.bfloat16), "f1b": jnp.asarray(f1b_p),
        "f2w": jnp.asarray(f2w_p, jnp.bfloat16), "f2b": jnp.asarray(f2b_p),
    }


# ----------------------------------------------------------------------------
# Forward pass (single fused pallas_call, gridded over the batch)
# ----------------------------------------------------------------------------
def net_forward(x, prep, *, block_batch=128):
    # block_batch is the batch tile per grid step; 128 is a good default on
    # v5e/v7x, 256 on v6e.  It is clamped for tiny demo batches.
    n = x.shape[0]
    bt = min(_round_up(block_batch, 8), _round_up(n, 8))
    npad = _round_up(n, bt)

    # layout plumbing only: [N,1,28,28] -> [28(h), N, 28(w)] so that conv row
    # taps are leading-dim slices inside the kernel; pad batch to a tile.
    xt = jnp.transpose(x[:, 0, :, :], (1, 0, 2))
    if npad != n:
        xt = jnp.pad(xt, ((0, 0), (0, npad - n), (0, 0)))

    def full(shape):
        return pl.BlockSpec(shape, lambda b: (0,) * len(shape))

    out = pl.pallas_call(
        _fused_net_kernel,
        out_shape=jax.ShapeDtypeStruct((npad, 128), jnp.float32),
        grid=(npad // bt,),
        in_specs=[
            pl.BlockSpec((28, bt, 28), lambda b: (0, b, 0)),   # input tile
            full((140, 256)),                                  # conv1 weights (bf16)
            full((1, 128)),                                    # conv1 bias
            full((5, 128, 256)),                               # conv2 weights (bf16)
            full((1, 128)),                                    # conv2 bias
            full((512, 128)),                                  # fc1 weights (bf16)
            full((1, 128)),                                    # fc1 bias
            full((128, 128)),                                  # fc2 weights (bf16)
            full((1, 128)),                                    # fc2 bias
        ],
        out_specs=pl.BlockSpec((bt, 128), lambda b: (b, 0)),
        compiler_params=pltpu.CompilerParams(
            dimension_semantics=("parallel",),
            vmem_limit_bytes=48 * 1024 * 1024,
        ),
    )(xt, prep["c1w"], prep["c1b"], prep["c2w"], prep["c2b"],
      prep["f1w"], prep["f1b"], prep["f2w"], prep["f2b"])

    return out[:n, :10]


# ----------------------------------------------------------------------------
# Pure-JAX f32 reference (for correctness verification only)
# ----------------------------------------------------------------------------
def reference_forward(x, params):
    dn = ("NCHW", "OIHW", "NCHW")
    prec = jax.lax.Precision.HIGHEST
    y = jax.lax.conv_general_dilated(x, params["w1"], (1, 1), "VALID",
                                     dimension_numbers=dn, precision=prec)
    y = y + params["b1"][None, :, None, None]
    y = jax.lax.reduce_window(y, -jnp.inf, jax.lax.max,
                              (1, 1, 2, 2), (1, 1, 2, 2), "VALID")
    y = jnp.maximum(y, 0.0)
    y = jax.lax.conv_general_dilated(y, params["w2"], (1, 1), "VALID",
                                     dimension_numbers=dn, precision=prec)
    y = y + params["b2"][None, :, None, None]
    y = jax.lax.reduce_window(y, -jnp.inf, jax.lax.max,
                              (1, 1, 2, 2), (1, 1, 2, 2), "VALID")
    y = jnp.maximum(y, 0.0)
    y = y.reshape(y.shape[0], 320)
    y = jnp.maximum(jnp.dot(y, params["fc1_w"].T, precision=prec) + params["fc1_b"], 0.0)
    y = jnp.dot(y, params["fc2_w"].T, precision=prec) + params["fc2_b"]
    return jax.nn.log_softmax(y, axis=-1)


def init_params(key):
    ks = jax.random.split(key, 8)

    def u(k, shape, fan_in):
        bound = 1.0 / jnp.sqrt(fan_in)
        return jax.random.uniform(k, shape, jnp.float32, -bound, bound)

    return {
        "w1": u(ks[0], (10, 1, 5, 5), 1 * 5 * 5),
        "b1": u(ks[1], (10,), 1 * 5 * 5),
        "w2": u(ks[2], (20, 10, 5, 5), 10 * 5 * 5),
        "b2": u(ks[3], (20,), 10 * 5 * 5),
        "fc1_w": u(ks[4], (50, 320), 320),
        "fc1_b": u(ks[5], (50,), 320),
        "fc2_w": u(ks[6], (10, 50), 50),
        "fc2_b": u(ks[7], (10,), 50),
    }


if __name__ == "__main__":
    key = jax.random.PRNGKey(0)
    pkey, xkey = jax.random.split(key)
    params = init_params(pkey)
    prep = prepare_params(params)          # hoisted: packed once, reused per call

    # MNIST-shaped input implied by the forward: [batch=2, 1, 28, 28]
    x = jax.random.normal(xkey, (2, 1, 28, 28), dtype=jnp.float32)

    fwd = jax.jit(net_forward)
    out = jax.block_until_ready(fwd(x, prep))

    assert out.shape == (2, 10), out.shape
    ref = jax.block_until_ready(reference_forward(x, params))
    err = float(jnp.max(jnp.abs(out - ref)))
    # Tolerance deliberately relaxed vs the f32 reference: the kernel runs the
    # MXU with bf16 operands (f32 accumulation) per the performance review.
    assert err < 3e-2, f"max abs err vs reference: {err}"
    assert jnp.allclose(jnp.sum(jnp.exp(out), axis=1), 1.0, atol=1e-4)
    print("KERNEL_OK")
</pallas_src>

<mosaic_0001>
module attributes {stable_mosaic.version = 11 : i64} {
  func.func @_fused_net_kernel(%arg0: i32, %arg1: memref<28x8x28xf32, #tpu.memory_space<vmem>>, %arg2: memref<140x256xbf16, #tpu.memory_space<vmem>>, %arg3: memref<1x128xf32, #tpu.memory_space<vmem>>, %arg4: memref<5x128x256xbf16, #tpu.memory_space<vmem>>, %arg5: memref<1x128xf32, #tpu.memory_space<vmem>>, %arg6: memref<512x128xbf16, #tpu.memory_space<vmem>>, %arg7: memref<1x128xf32, #tpu.memory_space<vmem>>, %arg8: memref<128x128xbf16, #tpu.memory_space<vmem>>, %arg9: memref<1x128xf32, #tpu.memory_space<vmem>>, %arg10: memref<8x128xf32, #tpu.memory_space<vmem>>) attributes {dimension_semantics = [#tpu.dimension_semantics<parallel>], iteration_bounds = array<i64: 1>, scalar_prefetch = 0 : i64, scratch_operands = 0 : i64, tpu.core_type = #tpu.core_type<tc>, window_params = [{transform_indices = @transform_0, window_bounds = array<i64: 28, 8, 28>}, {pipeline_mode = #tpu.pipeline_mode<synchronous>, transform_indices = @transform_1, window_bounds = array<i64: 140, 256>}, {pipeline_mode = #tpu.pipeline_mode<synchronous>, transform_indices = @transform_2, window_bounds = array<i64: 1, 128>}, {pipeline_mode = #tpu.pipeline_mode<synchronous>, transform_indices = @transform_3, window_bounds = array<i64: 5, 128, 256>}, {pipeline_mode = #tpu.pipeline_mode<synchronous>, transform_indices = @transform_4, window_bounds = array<i64: 1, 128>}, {pipeline_mode = #tpu.pipeline_mode<synchronous>, transform_indices = @transform_5, window_bounds = array<i64: 512, 128>}, {pipeline_mode = #tpu.pipeline_mode<synchronous>, transform_indices = @transform_6, window_bounds = array<i64: 1, 128>}, {pipeline_mode = #tpu.pipeline_mode<synchronous>, transform_indices = @transform_7, window_bounds = array<i64: 128, 128>}, {pipeline_mode = #tpu.pipeline_mode<synchronous>, transform_indices = @transform_8, window_bounds = array<i64: 1, 128>}, {transform_indices = @transform_9, window_bounds = array<i64: 8, 128>}]} {
    %c0 = arith.constant 0 : index
    %c0_0 = arith.constant 0 : index
    %c0_1 = arith.constant 0 : index
    %0 = vector.load %arg1[%c0, %c0_0, %c0_1] : memref<28x8x28xf32, #tpu.memory_space<vmem>>, vector<28x8x28xf32>
    %1 = vector.extract_strided_slice %0 {offsets = [0, 0, 0], sizes = [24, 8, 28], strides = [1, 1, 1]} : vector<28x8x28xf32> to vector<24x8x28xf32>
    %2 = vector.extract_strided_slice %0 {offsets = [1, 0, 0], sizes = [24, 8, 28], strides = [1, 1, 1]} : vector<28x8x28xf32> to vector<24x8x28xf32>
    %3 = vector.extract_strided_slice %0 {offsets = [2, 0, 0], sizes = [24, 8, 28], strides = [1, 1, 1]} : vector<28x8x28xf32> to vector<24x8x28xf32>
    %4 = vector.extract_strided_slice %0 {offsets = [3, 0, 0], sizes = [24, 8, 28], strides = [1, 1, 1]} : vector<28x8x28xf32> to vector<24x8x28xf32>
    %5 = vector.extract_strided_slice %0 {offsets = [4, 0, 0], sizes = [24, 8, 28], strides = [1, 1, 1]} : vector<28x8x28xf32> to vector<24x8x28xf32>
    %6 = tpu.concatenate %1, %2, %3, %4, %5 in 2 : vector<24x8x28xf32>, vector<24x8x28xf32>, vector<24x8x28xf32>, vector<24x8x28xf32>, vector<24x8x28xf32> -> vector<24x8x140xf32>
    %7 = vector.shape_cast %6 : vector<24x8x140xf32> to vector<192x140xf32>
    %8 = arith.truncf %7 : vector<192x140xf32> to vector<192x140xbf16>
    %c0_2 = arith.constant 0 : index
    %c0_3 = arith.constant 0 : index
    %9 = vector.load %arg2[%c0_2, %c0_3] : memref<140x256xbf16, #tpu.memory_space<vmem>>, vector<140x256xbf16>
    %cst = arith.constant dense<0.000000e+00> : vector<192x256xf32>
    %10 = tpu.matmul %8, %9, %cst {dimension_numbers = #tpu.dot_dimension_numbers<[1], [0], [0], [1], [0, 0, 1, 1], [], []>} : vector<192x140xbf16>, vector<140x256xbf16>, vector<192x256xf32> -> vector<192x256xf32>
    %11 = vector.extract_strided_slice %10 {offsets = [0, 0], sizes = [192, 128], strides = [1, 1]} : vector<192x256xf32> to vector<192x128xf32>
    %12 = vector.extract_strided_slice %10 {offsets = [0, 128], sizes = [192, 128], strides = [1, 1]} : vector<192x256xf32> to vector<192x128xf32>
    %13 = arith.maximumf %11, %12 : vector<192x128xf32>
    %14 = vector.shape_cast %13 : vector<192x128xf32> to vector<12x2x8x128xf32>
    %15 = vector.extract_strided_slice %14 {offsets = [0, 0, 0, 0], sizes = [12, 1, 8, 128], strides = [1, 1, 1, 1]} : vector<12x2x8x128xf32> to vector<12x1x8x128xf32>
    %16 = vector.shape_cast %15 : vector<12x1x8x128xf32> to vector<12x8x128xf32>
    %17 = vector.extract_strided_slice %14 {offsets = [0, 1, 0, 0], sizes = [12, 1, 8, 128], strides = [1, 1, 1, 1]} : vector<12x2x8x128xf32> to vector<12x1x8x128xf32>
    %18 = vector.shape_cast %17 : vector<12x1x8x128xf32> to vector<12x8x128xf32>
    %19 = arith.maximumf %16, %18 : vector<12x8x128xf32>
    %c0_4 = arith.constant 0 : index
    %c0_5 = arith.constant 0 : index
    %20 = vector.load %arg3[%c0_4, %c0_5] : memref<1x128xf32, #tpu.memory_space<vmem>>, vector<1x128xf32>
    %21 = vector.shape_cast %20 : vector<1x128xf32> to vector<1x1x128xf32>
    %22 = vector.broadcast %21 : vector<1x1x128xf32> to vector<12x8x128xf32>
    %23 = arith.addf %19, %22 : vector<12x8x128xf32>
    %cst_6 = arith.constant 0.000000e+00 : f32
    %24 = vector.broadcast %cst_6 : f32 to vector<12x8x128xf32>
    %25 = arith.maximumf %23, %24 : vector<12x8x128xf32>
    %26 = vector.extract_strided_slice %25 {offsets = [0, 0, 0], sizes = [8, 8, 128], strides = [1, 1, 1]} : vector<12x8x128xf32> to vector<8x8x128xf32>
    %27 = vector.shape_cast %26 : vector<8x8x128xf32> to vector<64x128xf32>
    %28 = arith.truncf %27 : vector<64x128xf32> to vector<64x128xbf16>
    %c0_7 = arith.constant 0 : index
    %c0_8 = arith.constant 0 : index
    %c0_9 = arith.constant 0 : index
    %29 = vector.load %arg4[%c0_7, %c0_8, %c0_9] : memref<5x128x256xbf16, #tpu.memory_space<vmem>>, vector<1x128x256xbf16>
    %30 = vector.shape_cast %29 : vector<1x128x256xbf16> to vector<128x256xbf16>
    %cst_10 = arith.constant dense<0.000000e+00> : vector<64x256xf32>
    %31 = tpu.matmul %28, %30, %cst_10 {dimension_numbers = #tpu.dot_dimension_numbers<[1], [0], [0], [1], [0, 0, 1, 1], [], []>} : vector<64x128xbf16>, vector<128x256xbf16>, vector<64x256xf32> -> vector<64x256xf32>
    %32 = vector.extract_strided_slice %25 {offsets = [1, 0, 0], sizes = [8, 8, 128], strides = [1, 1, 1]} : vector<12x8x128xf32> to vector<8x8x128xf32>
    %33 = vector.shape_cast %32 : vector<8x8x128xf32> to vector<64x128xf32>
    %34 = arith.truncf %33 : vector<64x128xf32> to vector<64x128xbf16>
    %c1 = arith.constant 1 : index
    %c0_11 = arith.constant 0 : index
    %c0_12 = arith.constant 0 : index
    %35 = vector.load %arg4[%c1, %c0_11, %c0_12] : memref<5x128x256xbf16, #tpu.memory_space<vmem>>, vector<1x128x256xbf16>
    %36 = vector.shape_cast %35 : vector<1x128x256xbf16> to vector<128x256xbf16>
    %cst_13 = arith.constant dense<0.000000e+00> : vector<64x256xf32>
    %37 = tpu.matmul %34, %36, %cst_13 {dimension_numbers = #tpu.dot_dimension_numbers<[1], [0], [0], [1], [0, 0, 1, 1], [], []>} : vector<64x128xbf16>, vector<128x256xbf16>, vector<64x256xf32> -> vector<64x256xf32>
    %38 = arith.addf %31, %37 : vector<64x256xf32>
    %39 = vector.extract_strided_slice %25 {offsets = [2, 0, 0], sizes = [8, 8, 128], strides = [1, 1, 1]} : vector<12x8x128xf32> to vector<8x8x128xf32>
    %40 = vector.shape_cast %39 : vector<8x8x128xf32> to vector<64x128xf32>
    %41 = arith.truncf %40 : vector<64x128xf32> to vector<64x128xbf16>
    %c2 = arith.constant 2 : index
    %c0_14 = arith.constant 0 : index
    %c0_15 = arith.constant 0 : index
    %42 = vector.load %arg4[%c2, %c0_14, %c0_15] : memref<5x128x256xbf16, #tpu.memory_space<vmem>>, vector<1x128x256xbf16>
    %43 = vector.shape_cast %42 : vector<1x128x256xbf16> to vector<128x256xbf16>
    %cst_16 = arith.constant dense<0.000000e+00> : vector<64x256xf32>
    %44 = tpu.matmul %41, %43, %cst_16 {dimension_numbers = #tpu.dot_dimension_numbers<[1], [0], [0], [1], [0, 0, 1, 1], [], []>} : vector<64x128xbf16>, vector<128x256xbf16>, vector<64x256xf32> -> vector<64x256xf32>
    %45 = arith.addf %38, %44 : vector<64x256xf32>
    %46 = vector.extract_strided_slice %25 {offsets = [3, 0, 0], sizes = [8, 8, 128], strides = [1, 1, 1]} : vector<12x8x128xf32> to vector<8x8x128xf32>
    %47 = vector.shape_cast %46 : vector<8x8x128xf32> to vector<64x128xf32>
    %48 = arith.truncf %47 : vector<64x128xf32> to vector<64x128xbf16>
    %c3 = arith.constant 3 : index
    %c0_17 = arith.constant 0 : index
    %c0_18 = arith.constant 0 : index
    %49 = vector.load %arg4[%c3, %c0_17, %c0_18] : memref<5x128x256xbf16, #tpu.memory_space<vmem>>, vector<1x128x256xbf16>
    %50 = vector.shape_cast %49 : vector<1x128x256xbf16> to vector<128x256xbf16>
    %cst_19 = arith.constant dense<0.000000e+00> : vector<64x256xf32>
    %51 = tpu.matmul %48, %50, %cst_19 {dimension_numbers = #tpu.dot_dimension_numbers<[1], [0], [0], [1], [0, 0, 1, 1], [], []>} : vector<64x128xbf16>, vector<128x256xbf16>, vector<64x256xf32> -> vector<64x256xf32>
    %52 = arith.addf %45, %51 : vector<64x256xf32>
    %53 = vector.extract_strided_slice %25 {offsets = [4, 0, 0], sizes = [8, 8, 128], strides = [1, 1, 1]} : vector<12x8x128xf32> to vector<8x8x128xf32>
    %54 = vector.shape_cast %53 : vector<8x8x128xf32> to vector<64x128xf32>
    %55 = arith.truncf %54 : vector<64x128xf32> to vector<64x128xbf16>
    %c4 = arith.constant 4 : index
    %c0_20 = arith.constant 0 : index
    %c0_21 = arith.constant 0 : index
    %56 = vector.load %arg4[%c4, %c0_20, %c0_21] : memref<5x128x256xbf16, #tpu.memory_space<vmem>>, vector<1x128x256xbf16>
    %57 = vector.shape_cast %56 : vector<1x128x256xbf16> to vector<128x256xbf16>
    %cst_22 = arith.constant dense<0.000000e+00> : vector<64x256xf32>
    %58 = tpu.matmul %55, %57, %cst_22 {dimension_numbers = #tpu.dot_dimension_numbers<[1], [0], [0], [1], [0, 0, 1, 1], [], []>} : vector<64x128xbf16>, vector<128x256xbf16>, vector<64x256xf32> -> vector<64x256xf32>
    %59 = arith.addf %52, %58 : vector<64x256xf32>
    %60 = vector.extract_strided_slice %59 {offsets = [0, 0], sizes = [64, 128], strides = [1, 1]} : vector<64x256xf32> to vector<64x128xf32>
    %61 = vector.extract_strided_slice %59 {offsets = [0, 128], sizes = [64, 128], strides = [1, 1]} : vector<64x256xf32> to vector<64x128xf32>
    %62 = arith.maximumf %60, %61 : vector<64x128xf32>
    %63 = vector.shape_cast %62 : vector<64x128xf32> to vector<4x2x8x128xf32>
    %64 = vector.extract_strided_slice %63 {offsets = [0, 0, 0, 0], sizes = [4, 1, 8, 128], strides = [1, 1, 1, 1]} : vector<4x2x8x128xf32> to vector<4x1x8x128xf32>
    %65 = vector.shape_cast %64 : vector<4x1x8x128xf32> to vector<4x8x128xf32>
    %66 = vector.extract_strided_slice %63 {offsets = [0, 1, 0, 0], sizes = [4, 1, 8, 128], strides = [1, 1, 1, 1]} : vector<4x2x8x128xf32> to vector<4x1x8x128xf32>
    %67 = vector.shape_cast %66 : vector<4x1x8x128xf32> to vector<4x8x128xf32>
    %68 = arith.maximumf %65, %67 : vector<4x8x128xf32>
    %c0_23 = arith.constant 0 : index
    %c0_24 = arith.constant 0 : index
    %69 = vector.load %arg5[%c0_23, %c0_24] : memref<1x128xf32, #tpu.memory_space<vmem>>, vector<1x128xf32>
    %70 = vector.shape_cast %69 : vector<1x128xf32> to vector<1x1x128xf32>
    %71 = vector.broadcast %70 : vector<1x1x128xf32> to vector<4x8x128xf32>
    %72 = arith.addf %68, %71 : vector<4x8x128xf32>
    %cst_25 = arith.constant 0.000000e+00 : f32
    %73 = vector.broadcast %cst_25 : f32 to vector<4x8x128xf32>
    %74 = arith.maximumf %72, %73 : vector<4x8x128xf32>
    %75 = vector.extract_strided_slice %74 {offsets = [0, 0, 0], sizes = [1, 8, 128], strides = [1, 1, 1]} : vector<4x8x128xf32> to vector<1x8x128xf32>
    %76 = vector.shape_cast %75 : vector<1x8x128xf32> to vector<8x128xf32>
    %77 = vector.extract_strided_slice %74 {offsets = [1, 0, 0], sizes = [1, 8, 128], strides = [1, 1, 1]} : vector<4x8x128xf32> to vector<1x8x128xf32>
    %78 = vector.shape_cast %77 : vector<1x8x128xf32> to vector<8x128xf32>
    %79 = vector.extract_strided_slice %74 {offsets = [2, 0, 0], sizes = [1, 8, 128], strides = [1, 1, 1]} : vector<4x8x128xf32> to vector<1x8x128xf32>
    %80 = vector.shape_cast %79 : vector<1x8x128xf32> to vector<8x128xf32>
    %81 = vector.extract_strided_slice %74 {offsets = [3, 0, 0], sizes = [1, 8, 128], strides = [1, 1, 1]} : vector<4x8x128xf32> to vector<1x8x128xf32>
    %82 = vector.shape_cast %81 : vector<1x8x128xf32> to vector<8x128xf32>
    %83 = tpu.concatenate %76, %78, %80, %82 in 1 : vector<8x128xf32>, vector<8x128xf32>, vector<8x128xf32>, vector<8x128xf32> -> vector<8x512xf32>
    %84 = arith.truncf %83 : vector<8x512xf32> to vector<8x512xbf16>
    %c0_26 = arith.constant 0 : index
    %c0_27 = arith.constant 0 : index
    %85 = vector.load %arg6[%c0_26, %c0_27] : memref<512x128xbf16, #tpu.memory_space<vmem>>, vector<512x128xbf16>
    %cst_28 = arith.constant dense<0.000000e+00> : vector<8x128xf32>
    %86 = tpu.matmul %84, %85, %cst_28 {dimension_numbers = #tpu.dot_dimension_numbers<[1], [0], [0], [1], [0, 0, 1, 1], [], []>} : vector<8x512xbf16>, vector<512x128xbf16>, vector<8x128xf32> -> vector<8x128xf32>
    %c0_29 = arith.constant 0 : index
    %c0_30 = arith.constant 0 : index
    %87 = vector.load %arg7[%c0_29, %c0_30] : memref<1x128xf32, #tpu.memory_space<vmem>>, vector<1x128xf32>
    %88 = vector.broadcast %87 : vector<1x128xf32> to vector<8x128xf32>
    %89 = arith.addf %86, %88 : vector<8x128xf32>
    %cst_31 = arith.constant 0.000000e+00 : f32
    %90 = vector.broadcast %cst_31 : f32 to vector<8x128xf32>
    %91 = arith.maximumf %89, %90 : vector<8x128xf32>
    %92 = arith.truncf %91 : vector<8x128xf32> to vector<8x128xbf16>
    %c0_32 = arith.constant 0 : index
    %c0_33 = arith.constant 0 : index
    %93 = vector.load %arg8[%c0_32, %c0_33] : memref<128x128xbf16, #tpu.memory_space<vmem>>, vector<128x128xbf16>
    %cst_34 = arith.constant dense<0.000000e+00> : vector<8x128xf32>
    %94 = tpu.matmul %92, %93, %cst_34 {dimension_numbers = #tpu.dot_dimension_numbers<[1], [0], [0], [1], [0, 0, 1, 1], [], []>} : vector<8x128xbf16>, vector<128x128xbf16>, vector<8x128xf32> -> vector<8x128xf32>
    %c0_35 = arith.constant 0 : index
    %c0_36 = arith.constant 0 : index
    %95 = vector.load %arg9[%c0_35, %c0_36] : memref<1x128xf32, #tpu.memory_space<vmem>>, vector<1x128xf32>
    %96 = vector.broadcast %95 : vector<1x128xf32> to vector<8x128xf32>
    %97 = arith.addf %94, %96 : vector<8x128xf32>
    %98 = tpu.iota {dimensions = array<i32: 1>} : vector<8x128xi32>
    %c10_i32 = arith.constant 10 : i32
    %99 = vector.broadcast %c10_i32 : i32 to vector<8x128xi32>
    %100 = arith.cmpi slt, %98, %99 : vector<8x128xi32>
    %cst_37 = arith.constant -1.000000e+30 : f32
    %101 = vector.broadcast %cst_37 : f32 to vector<8x128xf32>
    %102 = arith.select %100, %97, %101 : vector<8x128xi1>, vector<8x128xf32>
    %cst_38 = arith.constant dense<0xFF800000> : vector<8xf32>
    %103 = vector.multi_reduction <maximumf>, %102, %cst_38 [1] : vector<8x128xf32> to vector<8xf32>
    %104 = vector.shape_cast %103 : vector<8xf32> to vector<8x1xf32>
    %105 = vector.broadcast %104 : vector<8x1xf32> to vector<8x128xf32>
    %106 = arith.subf %102, %105 : vector<8x128xf32>
    %107 = math.exp %106 : vector<8x128xf32>
    %cst_39 = arith.constant dense<0.000000e+00> : vector<8xf32>
    %108 = vector.multi_reduction <add>, %107, %cst_39 [1] : vector<8x128xf32> to vector<8xf32>
    %109 = vector.shape_cast %108 : vector<8xf32> to vector<8x1xf32>
    %110 = math.log %109 : vector<8x1xf32>
    %111 = arith.addf %104, %110 : vector<8x1xf32>
    %112 = vector.broadcast %111 : vector<8x1xf32> to vector<8x128xf32>
    %113 = arith.subf %102, %112 : vector<8x128xf32>
    %c0_40 = arith.constant 0 : index
    %c0_41 = arith.constant 0 : index
    %114 = vector.load %arg10[%c0_40, %c0_41] : memref<8x128xf32, #tpu.memory_space<vmem>>, vector<8x128xf32>
    tpu.vector_store %arg10[%c0_40, %c0_41], %113 {strides = array<i32>} : memref<8x128xf32, #tpu.memory_space<vmem>>, vector<8x128xf32>,
    return
  }
  func.func @transform_0(%arg0: i32) -> (i32, i32, i32) {
    %c0_i32 = arith.constant 0 : i32
    %c0_i32_0 = arith.constant 0 : i32
    %c0_i32_1 = arith.constant 0 : i32
    return %c0_i32, %arg0, %c0_i32_0 : i32, i32, i32
  }
  func.func @transform_1(%arg0: i32) -> (i32, i32) {
    %c0_i32 = arith.constant 0 : i32
    %c0_i32_0 = arith.constant 0 : i32
    %c0_i32_1 = arith.constant 0 : i32
    return %c0_i32, %c0_i32_0 : i32, i32
  }
  func.func @transform_2(%arg0: i32) -> (i32, i32) {
    %c0_i32 = arith.constant 0 : i32
    %c0_i32_0 = arith.constant 0 : i32
    %c0_i32_1 = arith.constant 0 : i32
    return %c0_i32, %c0_i32_0 : i32, i32
  }
  func.func @transform_3(%arg0: i32) -> (i32, i32, i32) {
    %c0_i32 = arith.constant 0 : i32
    %c0_i32_0 = arith.constant 0 : i32
    %c0_i32_1 = arith.constant 0 : i32
    %c0_i32_2 = arith.constant 0 : i32
    return %c0_i32, %c0_i32_0, %c0_i32_1 : i32, i32, i32
  }
  func.func @transform_4(%arg0: i32) -> (i32, i32) {
    %c0_i32 = arith.constant 0 : i32
    %c0_i32_0 = arith.constant 0 : i32
    %c0_i32_1 = arith.constant 0 : i32
    return %c0_i32, %c0_i32_0 : i32, i32
  }
  func.func @transform_5(%arg0: i32) -> (i32, i32) {
    %c0_i32 = arith.constant 0 : i32
    %c0_i32_0 = arith.constant 0 : i32
    %c0_i32_1 = arith.constant 0 : i32
    return %c0_i32, %c0_i32_0 : i32, i32
  }
  func.func @transform_6(%arg0: i32) -> (i32, i32) {
    %c0_i32 = arith.constant 0 : i32
    %c0_i32_0 = arith.constant 0 : i32
    %c0_i32_1 = arith.constant 0 : i32
    return %c0_i32, %c0_i32_0 : i32, i32
  }
  func.func @transform_7(%arg0: i32) -> (i32, i32) {
    %c0_i32 = arith.constant 0 : i32
    %c0_i32_0 = arith.constant 0 : i32
    %c0_i32_1 = arith.constant 0 : i32
    return %c0_i32, %c0_i32_0 : i32, i32
  }
  func.func @transform_8(%arg0: i32) -> (i32, i32) {
    %c0_i32 = arith.constant 0 : i32
    %c0_i32_0 = arith.constant 0 : i32
    %c0_i32_1 = arith.constant 0 : i32
    return %c0_i32, %c0_i32_0 : i32, i32
  }
  func.func @transform_9(%arg0: i32) -> (i32, i32) {
    %c0_i32 = arith.constant 0 : i32
    %c0_i32_0 = arith.constant 0 : i32
    return %arg0, %c0_i32 : i32, i32
  }
}

</mosaic_0001>

<bundles_post_ra>
// kernel: net_forward.1
= control target key start
LH: loop header
LB: loop body
LE: loop exit
PB: predicated region body
PF: predicated region fallthrough
CT: control target
= control target key end

     0   :  { %14 = vsyncpa [#allocation3], 0  ;;  %s3778_s0 = inlined_call_operand.vmem [shape: f32[28,8,28], index: 0, kind: input, shape index: {}]   ;;  %s3779_s1 = inlined_call_operand.vmem [shape: bf16[140,256], index: 1, kind: input, shape index: {}]   ;;  %s3780_s2 = inlined_call_operand.vmem [shape: f32[1,128], index: 2, kind: input, shape index: {}]   ;;  %s3781_s3 = inlined_call_operand.hbm [shape: bf16[5,128,256], index: 3, kind: input, shape index: {}]   ;;  %s3782_s4 = inlined_call_operand.vmem [shape: f32[1,128], index: 4, kind: input, shape index: {}]   ;;  %s3783_s5 = inlined_call_operand.vmem [shape: bf16[512,128], index: 5, kind: input, shape index: {}]   ;;  %s3784_s6 = inlined_call_operand.vmem [shape: f32[1,128], index: 6, kind: input, shape index: {}]   ;;  %s3785_s7 = inlined_call_operand.hbm [shape: bf16[128,128], index: 7, kind: input, shape index: {}]   ;;  %s3786_s8 = inlined_call_operand.vmem [shape: f32[1,128], index: 8, kind: input, shape index: {}]   ;;  %s3787_s9 = inlined_call_operand.vmem [shape: f32[8,128], index: 9, kind: output, shape index: {}]  }
   0x1   :  { %15 = vsyncpa [#allocation5], 0  ;;  %s3099_s30 = smov [#allocation2]   ;;  %s3051_s13 = scalar_lea.hbm %s3781_s3, 10240 }
   0x2   :  { %s27_s10 = sshll.u32 %s3099_s30, 4  ;;  %p3052_p0 = scmp.ne.s32.totalorder %s3781_s3, %s3051_s13  ;;  %s28_s10 = int_to_ptr.vmem [resolvable:$true] %s27_s10 }
   0x3   :  { %p3055_p1 = scmp.lt.u32.totalorder %s3051_s13, %s3781_s3 }
   0x5   :  { %p3057_p2 = pnand %p3055_p1, %p3052_p0 }
   0x7   :  { %3060 = shalt.err (!%p3057_p2)
}
   0x8   :  { %s3061_s18 = scalar_lea.vmem %s28_s10, 10240  ;;  %p3066_p4 = scmp.lt.s32.totalorder %s28_s10, %s28_s10 }
   0x9   :  { %p3062_p3 = scmp.ne.s32.totalorder %s28_s10, %s3061_s18  ;;  %p3067_p5 = scmp.lt.s32.totalorder %s3061_s18, %s3061_s18 }
   0xb   :  { %p3068_p6 = por %p3067_p5, %p3066_p4 }
   0xd   :  { %p3069_p7 = pnand %p3068_p6, %p3062_p3 }
   0xf   :  { %3072 = shalt.err (!%p3069_p7)
}
  0x10   :  { %s3100_s19 = smov 128   ;;  %s3101_s20 = smov 8  }
  0x11   :  { %33 = dma.hbm_to_vmem [thread:$0]  %s3781_s3, 10240, %s28_s10, [#allocation3], %s3100_s19, %s3100_s19, %s3101_s20  }
  0x12   :  { %s3102_s23 = smov [#allocation4]   ;;  %s3073_s27 = scalar_lea.hbm %s3785_s7, 1024 }
  0x13   :  { %s45_s24 = sshll.u32 %s3102_s23, 4  ;;  %p3074_p8 = scmp.ne.s32.totalorder %s3785_s7, %s3073_s27  ;;  %s46_s24 = int_to_ptr.vmem [resolvable:$true] %s45_s24 }
  0x14   :  { %p3077_p9 = scmp.lt.u32.totalorder %s3073_s27, %s3785_s7 }
  0x16   :  { %p3079_p10 = pnand %p3077_p9, %p3074_p8 }
  0x18   :  { %3082 = shalt.err (!%p3079_p10)
}
  0x19   :  { %s3083_s12 = scalar_lea.vmem %s46_s24, 1024  ;;  %p3088_p12 = scmp.lt.s32.totalorder %s46_s24, %s46_s24 }
  0x1a   :  { %p3084_p11 = scmp.ne.s32.totalorder %s46_s24, %s3083_s12  ;;  %p3089_p13 = scmp.lt.s32.totalorder %s3083_s12, %s3083_s12 }
  0x1c   :  { %p3090_p0 = por %p3089_p13, %p3088_p12 }
  0x1e   :  { %p3091_p1 = pnand %p3090_p0, %p3084_p11 }
  0x20   :  { %3094 = shalt.err (!%p3091_p1)
}
  0x21   :  { %s3103_s3 = smov 64   ;;  %s3104_s10 = smov 4  }
  0x22   :  { %51 = dma.hbm_to_vmem [thread:$0]  %s3785_s7, 1024, %s46_s24, [#allocation5], %s3103_s3, %s3103_s3, %s3104_s10  }
  0x23   :  { %3095 = dma.done.wait [#allocation3], 10240  }
  0x24   :  { %3096 = vsyncadd [#allocation3], 4294957056 }
  0x25   :  { %3097 = dma.done.wait [#allocation5], 1024  }
  0x26   :  { %3098 = vsyncadd [#allocation5], 4294966272  ;;  %v3189_v0 = vld [vmem:[%s3778_s0 + $0x8] sm:$0xff]  ;;  %v3194_v1 = vld [vmem:[%s3778_s0 + $0x10] sm:$0xff]  ;;  %s3105_s24 = smov 28   ;;  %s3106_s25 = smov 84  }
  0x27   :  { %v3199_v2 = vld [vmem:[%s3778_s0 + $0x18] sm:$0xff]  ;;  %v2620_v3 = vpack.i.bf16 %v3194_v1, %v3189_v0  ;;  %v3206_v4 = vld [vmem:[%s3778_s0 + $0x20] sm:$0xff]  ;;  %v3211_v5 = vld [vmem:[%s3778_s0 + $0x28] sm:$0xff]  ;;  %s3107_s26 = smov 56   ;;  %s3108_s11 = smov 112   ;;  %vm671_vm0 = vcmask 1045504  }
  0x28   :  { %v2630_v6 = vpack.i.bf16 %v3206_v4, %v3199_v2  ;;  %v2625_v7 = vpack.i.bf16 %v3199_v2, %v3194_v1  ;;  %v2635_v8 = vpack.i.bf16 %v3211_v5, %v3206_v4  ;;  %v3225_v9 = vld [vmem:[%s3778_s0 + $0x30] sm:$0xff]  ;;  %v3230_v10 = vld [vmem:[%s3778_s0 + $0x38] sm:$0xff]  ;;  %v2860_v11 = vld [vmem:[%s3779_s1 + $0x4] ss:$8 sps:$4 sm:$0xff]   ;;  %vm404_vm1 = vcmask 228352  }
  0x29   :  { %2621 = vrot.lane.b32.xlu0 %v2620_v3, %s3105_s24  ;;  %v2862_v12 = vld [vmem:[%s3779_s1] ss:$8 sps:$4 sm:$0xff]   ;;  %v2863_v13 = vld [vmem:[%s3779_s1 + $0x14] ss:$8 sps:$4 sm:$0xff]   ;;  %678 = vmatprep.subr.bf16.mxu0 %v2860_v11  ;;  %v2650_v14 = vpack.i.bf16 %v3225_v9, %v3211_v5  ;;  %v2865_v15 = vld [vmem:[%s3779_s1 + $0x10] ss:$8 sps:$4 sm:$0xff]   ;;  %v2655_v16 = vpack.i.bf16 %v3230_v10, %v3225_v9 }
  0x2a   :  { %2631 = vrot.lane.b32.xlu1 %v2630_v6, %s3106_s25  ;;  %679 = vmatpush1.bf16.msra.mxu0 %v2862_v12  ;;  %v2866_v17 = vld [vmem:[%s3779_s1 + $0x24] ss:$8 sps:$4 sm:$0xff]   ;;  %v2868_v18 = vld [vmem:[%s3779_s1 + $0x20] ss:$8 sps:$4 sm:$0xff]   ;;  %v2869_v20 = vld [vmem:[%s3779_s1 + $0x34] ss:$8 sps:$4 sm:$0xff]  }
  0x2b   :  { %680 = vmatprep.subr.bf16.mxu0 %v2863_v13  ;;  %v3262_v19 = vld [vmem:[%s3778_s0 + $0x40] sm:$0xff]  ;;  %v3270_v21 = vld [vmem:[%s3778_s0 + $0x48] sm:$0xff]  ;;  %v2871_v23 = vld [vmem:[%s3779_s1 + $0x30] ss:$8 sps:$4 sm:$0xff]   ;;  %vm429_vm2 = vcmask 457728   ;;  %vm454_vm3 = vcmask 687104  }
  0x2c   :  { %v2670_v22 = vpack.i.bf16 %v3262_v19, %v3230_v10  ;;  %v2675_v24 = vpack.i.bf16 %v3270_v21, %v3262_v19  ;;  %v2872_v25 = vld [vmem:[%s3779_s1 + $0x44] ss:$8 sps:$4 sm:$0xff]   ;;  %v2874_v26 = vld [vmem:[%s3779_s1 + $0x40] ss:$8 sps:$4 sm:$0xff]   ;;  %v3290_v27 = vld [vmem:[%s3778_s0 + $0x50] sm:$0xff]  ;;  %vm479_vm4 = vcmask 916480  }
  0x2d   :  { %2626 = vrot.lane.b32.xlu0 %v2625_v7, %s3107_s26  ;;  %v2875_v28 = vld [vmem:[%s3779_s1 + $0x54] ss:$8 sps:$4 sm:$0xff]   ;;  %v2877_v30 = vld [vmem:[%s3779_s1 + $0x50] ss:$8 sps:$4 sm:$0xff]   ;;  %v2878_v31 = vld [vmem:[%s3779_s1 + $0x64] ss:$8 sps:$4 sm:$0xff]   ;;  %v2690_v32 = vpack.i.bf16 %v3290_v27, %v3270_v21 }
  0x2e   :  { %2636 = vrot.lane.b32.xlu1 %v2635_v8, %s3108_s11  ;;  %681 = vmatpush1.bf16.msra.mxu0 %v2865_v15  ;;  %v3299_v29 = vld [vmem:[%s3778_s0 + $0x58] sm:$0xff]  ;;  %v2880_v34 = vld [vmem:[%s3779_s1 + $0x60] ss:$8 sps:$4 sm:$0xff]   ;;  %v2884_v39 = vld [vmem:[%s3779_s1 + $0x84] ss:$8 sps:$4 sm:$0x3f]  }
  0x2f   :  { %682 = vmatprep.subr.bf16.mxu0 %v2866_v17  ;;  %v2695_v33 = vpack.i.bf16 %v3299_v29, %v3290_v27  ;;  %v3320_v35 = vld [vmem:[%s3778_s0 + $0x60] sm:$0xff]  ;;  %v3326_v36 = vld [vmem:[%s3778_s0 + $0x68] sm:$0xff]  ;;  %v2881_v37 = vld [vmem:[%s3779_s1 + $0x74] ss:$8 sps:$4 sm:$0xff]   ;;  %vm634_vm5 = vcmask 97280   ;;  %vm3111_vm6 = vmmov 0  }
  0x30   :  { %v2883_v38 = vld [vmem:[%s3779_s1 + $0x70] ss:$8 sps:$4 sm:$0xff]   ;;  %v2886_v40 = vld [vmem:[%s3779_s1 + $0x80] ss:$8 sps:$4 sm:$0x3f]   ;;  %v2710_v41 = vpack.i.bf16 %v3320_v35, %v3299_v29  ;;  %v2715_v42 = vpack.i.bf16 %v3326_v36, %v3320_v35 }
  0x31   :  { %2641 = vrot.lane.b32.xlu0 %v2630_v6, %s3105_s24  ;;  %v3350_v43 = vld [vmem:[%s3778_s0 + $0x70] sm:$0xff]  ;;  %v3356_v44 = vld [vmem:[%s3778_s0 + $0x78] sm:$0xff]  ;;  %v673_v45 = vsel %vm671_vm0, %v2886_v40, 0  ;;  %v3368_v48 = vld [vmem:[%s3778_s0 + $0x80] sm:$0xff] }
  0x32   :  { %2646 = vrot.lane.b32.xlu1 %v2635_v8, %s3107_s26  ;;  %683 = vmatpush1.bf16.msra.mxu0 %v2868_v18  ;;  %v2730_v46 = vpack.i.bf16 %v3350_v43, %v3326_v36  ;;  %v2735_v47 = vpack.i.bf16 %v3356_v44, %v3350_v43  ;;  %v3374_v49 = vld [vmem:[%s3778_s0 + $0x88] sm:$0xff]  ;;  %v2750_v50 = vpack.i.bf16 %v3368_v48, %v3356_v44  ;;  %v3386_v52 = vld [vmem:[%s3778_s0 + $0x90] sm:$0xff]  ;;  %v3392_v53 = vld [vmem:[%s3778_s0 + $0x98] sm:$0xff] }
  0x33   :  { %684 = vmatprep.subr.bf16.mxu0 %v2869_v20  ;;  %v2755_v51 = vpack.i.bf16 %v3374_v49, %v3368_v48  ;;  %v2770_v54 = vpack.i.bf16 %v3386_v52, %v3374_v49  ;;  %v2775_v55 = vpack.i.bf16 %v3392_v53, %v3386_v52  ;;  %v3404_v56 = vld [vmem:[%s3778_s0 + $0xa0] sm:$0xff]  ;;  %v3410_v57 = vld [vmem:[%s3778_s0 + $0xa8] sm:$0xff]  ;;  %v3422_v60 = vld [vmem:[%s3778_s0 + $0xb0] sm:$0xff] }
  0x34   :  { %v2790_v58 = vpack.i.bf16 %v3404_v56, %v3392_v53  ;;  %v2795_v59 = vpack.i.bf16 %v3410_v57, %v3404_v56  ;;  %v3428_v61 = vld [vmem:[%s3778_s0 + $0xb8] sm:$0xff]  ;;  %v2810_v62 = vpack.i.bf16 %v3422_v60, %v3410_v57  ;;  %v85_v3 = vld [vmem:[%s3778_s0 + $0xc0] sm:$0xff]  ;;  %v86_v6 = vld [vmem:[%s3778_s0 + $0xc8] sm:$0xff] }
  0x35   :  { %2651 = vrot.lane.b32.xlu0 %v2650_v14, %s3106_s25  ;;  %v2815_v63 = vpack.i.bf16 %v3428_v61, %v3422_v60  ;;  %v2830_v7 = vpack.i.bf16 %v85_v3, %v3428_v61  ;;  %v2835_v8 = vpack.i.bf16 %v86_v6, %v85_v3  ;;  %v87_v11 = vld [vmem:[%s3778_s0 + $0xd0] sm:$0xff]  ;;  %v88_v12 = vld [vmem:[%s3778_s0 + $0xd8] sm:$0xff]  ;;  %v2887_v13 = vld [vmem:[#allocation2 + $0x84] ss:$8 sps:$4 sm:$0xff]  }
  0x36   :  { %2656 = vrot.lane.b32.xlu1 %v2655_v16, %s3108_s11  ;;  %685 = vmatpush1.bf16.msra.mxu0 %v2871_v23  ;;  %v2850_v15 = vpack.i.bf16 %v87_v11, %v86_v6  ;;  %v61_v23 = vld [vmem:[%s3778_s0] sm:$0xff] }
  0x37   :  { %686 = vmatprep.subr.bf16.mxu0 %v2872_v25  ;;  %1019 = vmatprep.subr.bf16.mxu1 %v2887_v13 }
  0x39   :  { %2661 = vrot.lane.b32.xlu0 %v2650_v14, %s3105_s24  ;;  %v2889_v14 = vld [vmem:[#allocation2 + $0x80] ss:$8 sps:$4 sm:$0xff]  }
  0x3a   :  { %2666 = vrot.lane.b32.xlu1 %v2655_v16, %s3107_s26  ;;  %687 = vmatpush1.bf16.msra.mxu0 %v2874_v26  ;;  %v2855_v16 = vpack.i.bf16 %v88_v12, %v87_v11 }
  0x3b   :  { %688 = vmatprep.subr.bf16.mxu0 %v2875_v28  ;;  %1020 = vmatpush1.bf16.msra.mxu1 %v2889_v14 }
  0x3d   :  { %2671 = vrot.lane.b32.xlu0 %v2670_v22, %s3106_s25 }
  0x3e   :  { %2676 = vrot.lane.b32.xlu1 %v2675_v24, %s3108_s11  ;;  %689 = vmatpush1.bf16.msra.mxu0 %v2877_v30 }
  0x3f   :  { %690 = vmatprep.subr.bf16.mxu0 %v2878_v31 }
  0x41   :  { %2681 = vrot.lane.b32.xlu0 %v2670_v22, %s3105_s24 }
  0x42   :  { %2686 = vrot.lane.b32.xlu1 %v2675_v24, %s3107_s26  ;;  %691 = vmatpush1.bf16.msra.mxu0 %v2880_v34 }
  0x43   :  { %692 = vmatprep.subr.bf16.mxu0 %v2881_v37 }
  0x45   :  { %2691 = vrot.lane.b32.xlu0 %v2690_v32, %s3106_s25 }
  0x46   :  { %2696 = vrot.lane.b32.xlu1 %v2695_v33, %s3108_s11  ;;  %693 = vmatpush1.bf16.msra.mxu0 %v2883_v38 }
  0x47   :  { %2333 = vmatprep.subr.msk.bf16.mxu0 %vm671_vm0, %v2884_v39 }
  0x49   :  { %2701 = vrot.lane.b32.xlu0 %v2690_v32, %s3105_s24 }
  0x4a   :  { %2706 = vrot.lane.b32.xlu1 %v2695_v33, %s3107_s26  ;;  %695 = vmatpush1.bf16.msra.mxu0 %v673_v45 }
  0x4d   :  { %2711 = vrot.lane.b32.xlu0 %v2710_v41, %s3106_s25 }
  0x4e   :  { %2716 = vrot.lane.b32.xlu1 %v2715_v42, %s3108_s11 }
  0x51   :  { %2721 = vrot.lane.b32.xlu0 %v2710_v41, %s3105_s24 }
  0x52   :  { %2726 = vrot.lane.b32.xlu1 %v2715_v42, %s3107_s26 }
  0x55   :  { %2731 = vrot.lane.b32.xlu0 %v2730_v46, %s3106_s25 }
  0x56   :  { %2736 = vrot.lane.b32.xlu1 %v2735_v47, %s3108_s11 }
  0x59   :  { %2741 = vrot.lane.b32.xlu0 %v2730_v46, %s3105_s24 }
  0x5a   :  { %2746 = vrot.lane.b32.xlu1 %v2735_v47, %s3107_s26 }
  0x5d   :  { %2751 = vrot.lane.b32.xlu0 %v2750_v50, %s3106_s25 }
  0x5e   :  { %2756 = vrot.lane.b32.xlu1 %v2755_v51, %s3108_s11 }
  0x61   :  { %2761 = vrot.lane.b32.xlu0 %v2750_v50, %s3105_s24 }
  0x62   :  { %2766 = vrot.lane.b32.xlu1 %v2755_v51, %s3107_s26 }
  0x65   :  { %2771 = vrot.lane.b32.xlu0 %v2770_v54, %s3106_s25 }
  0x66   :  { %2776 = vrot.lane.b32.xlu1 %v2775_v55, %s3108_s11 }
  0x69   :  { %2781 = vrot.lane.b32.xlu0 %v2770_v54, %s3105_s24 }
  0x6a   :  { %2786 = vrot.lane.b32.xlu1 %v2775_v55, %s3107_s26 }
  0x6d   :  { %2791 = vrot.lane.b32.xlu0 %v2790_v58, %s3106_s25 }
  0x6e   :  { %2796 = vrot.lane.b32.xlu1 %v2795_v59, %s3108_s11 }
  0x71   :  { %2801 = vrot.lane.b32.xlu0 %v2790_v58, %s3105_s24 }
  0x72   :  { %2806 = vrot.lane.b32.xlu1 %v2795_v59, %s3107_s26 }
  0x75   :  { %2811 = vrot.lane.b32.xlu0 %v2810_v62, %s3106_s25 }
  0x76   :  { %2816 = vrot.lane.b32.xlu1 %v2815_v63, %s3108_s11 }
  0x79   :  { %2821 = vrot.lane.b32.xlu0 %v2810_v62, %s3105_s24 }
  0x7a   :  { %2826 = vrot.lane.b32.xlu1 %v2815_v63, %s3107_s26 }
  0x7d   :  { %2831 = vrot.lane.b32.xlu0 %v2830_v7, %s3106_s25 }
  0x7e   :  { %2836 = vrot.lane.b32.xlu1 %v2835_v8, %s3108_s11 }
  0x81   :  { %2841 = vrot.lane.b32.xlu0 %v2830_v7, %s3105_s24 }
  0x82   :  { %2846 = vrot.lane.b32.xlu1 %v2835_v8, %s3107_s26 }
  0x85   :  { %2851 = vrot.lane.b32.xlu0 %v2850_v15, %s3106_s25 }
  0x86   :  { %2856 = vrot.lane.b32.xlu1 %v2855_v16, %s3108_s11 }
  0x9b   :  { %v2622_v17 = vpop.permute.xlu0 %2621 }
  0x9c   :  { %v2632_v18 = vpop.permute.xlu1 %2631  ;;  %v2624_v20 = vunpack.i.h.bf16 %v2622_v17  ;;  %v2623_v22 = vunpack.i.l.bf16 %v2622_v17 }
  0x9d   :  { %v2634_v25 = vunpack.i.h.bf16 %v2632_v18  ;;  %v2633_v26 = vunpack.i.l.bf16 %v2632_v18 }
  0x9e   :  { %v406_v32 = vsel %vm404_vm1, %v3189_v0, %v2624_v20  ;;  %v405_v33 = vsel %vm404_vm1, %v61_v23, %v2623_v22 }
  0x9f   :  { %v2627_v24 = vpop.permute.xlu0 %2626 }
  0xa0   :  { %v2629_v28 = vunpack.i.h.bf16 %v2627_v24  ;;  %v2628_v30 = vunpack.i.l.bf16 %v2627_v24  ;;  %v2637_v31 = vpop.permute.xlu1 %2636 }
  0xa1   :  { %v2639_v34 = vunpack.i.h.bf16 %v2637_v31  ;;  %v2638_v37 = vunpack.i.l.bf16 %v2637_v31 }
  0xa2   :  { %v430_v38 = vsel %vm429_vm2, %v405_v33, %v2628_v30  ;;  %v431_v39 = vsel %vm429_vm2, %v406_v32, %v2629_v28 }
  0xa3   :  { %v2642_v40 = vpop.permute.xlu0 %2641  ;;  %v505_v41 = vpack.c.bf16 %v2639_v34, %v2638_v37  ;;  %v455_v42 = vsel %vm454_vm3, %v430_v38, %v2633_v26  ;;  %v456_v45 = vsel %vm454_vm3, %v431_v39, %v2634_v25 }
  0xa4   :  { %v2644_v46 = vunpack.i.h.bf16 %v2642_v40  ;;  %v2643_v47 = vunpack.i.l.bf16 %v2642_v40  ;;  %v2647_v50 = vpop.permute.xlu1 %2646  ;;  %v480_v0 = vsel %vm479_vm4, %v455_v42, %v2638_v37  ;;  %v481_v51 = vsel %vm479_vm4, %v456_v45, %v2639_v34 }
  0xa5   :  { %v2649_v54 = vunpack.i.h.bf16 %v2647_v50  ;;  %v2648_v55 = vunpack.i.l.bf16 %v2647_v50  ;;  %2334 = vmatprep.mubr.msk.bf16.mxu0 %vm634_vm5, %v505_v41  ;;  %v504_v58 = vpack.c.bf16 %v481_v51, %v480_v0 }
  0xa6   :  { %v408_v59 = vsel %vm404_vm1, %v3199_v2, %v2644_v46  ;;  %v407_v62 = vsel %vm404_vm1, %v3194_v1, %v2643_v47 }
  0xa7   :  { %v432_v63 = vsel %vm429_vm2, %v407_v62, %v2648_v55  ;;  %v433_v3 = vsel %vm429_vm2, %v408_v59, %v2649_v54  ;;  %v2652_v6 = vpop.permute.xlu0 %2651  ;;  %711 = vmatmul.mubr.bf16.vlgmr.msra.gmra.mrb[0].mxu0 %v504_v58 }
  0xa8   :  { %v2654_v7 = vunpack.i.h.bf16 %v2652_v6  ;;  %v2653_v8 = vunpack.i.l.bf16 %v2652_v6  ;;  %v2657_v11 = vpop.permute.xlu1 %2656 }
  0xa9   :  { %v2659_v12 = vunpack.i.h.bf16 %v2657_v11  ;;  %v2658_v13 = vunpack.i.l.bf16 %v2657_v11 }
  0xaa   :  { %v457_v14 = vsel %vm454_vm3, %v432_v63, %v2653_v8  ;;  %v458_v15 = vsel %vm454_vm3, %v433_v3, %v2654_v7 }
  0xab   :  { %v507_v16 = vpack.c.bf16 %v2659_v12, %v2658_v13  ;;  %v2662_v2 = vpop.permute.xlu0 %2661  ;;  %v482_v17 = vsel %vm479_vm4, %v457_v14, %v2658_v13  ;;  %v483_v1 = vsel %vm479_vm4, %v458_v15, %v2659_v12 }
  0xac   :  { %v2664_v18 = vunpack.i.h.bf16 %v2662_v2  ;;  %v2663_v20 = vunpack.i.l.bf16 %v2662_v2  ;;  %v2667_v22 = vpop.permute.xlu1 %2666  ;;  %v506_v23 = vpack.c.bf16 %v483_v1, %v482_v17 }
  0xad   :  { %v2669_v24 = vunpack.i.h.bf16 %v2667_v22  ;;  %v2668_v25 = vunpack.i.l.bf16 %v2667_v22  ;;  %2335 = vmatprep.mubr.msk.bf16.mxu0 %vm634_vm5, %v507_v16 }
  0xae   :  { %v410_v26 = vsel %vm404_vm1, %v3211_v5, %v2664_v18  ;;  %v409_v28 = vsel %vm404_vm1, %v3206_v4, %v2663_v20 }
  0xaf   :  { %v434_v30 = vsel %vm429_vm2, %v409_v28, %v2668_v25  ;;  %v435_v31 = vsel %vm429_vm2, %v410_v26, %v2669_v24  ;;  %v2672_v32 = vpop.permute.xlu0 %2671  ;;  %721 = vmatmul.mubr.bf16.gmra.mrb[4].mxu0 %v506_v23 }
  0xb0   :  { %v2674_v33 = vunpack.i.h.bf16 %v2672_v32  ;;  %v2673_v34 = vunpack.i.l.bf16 %v2672_v32  ;;  %v2677_v37 = vpop.permute.xlu1 %2676 }
  0xb1   :  { %v2679_v38 = vunpack.i.h.bf16 %v2677_v37  ;;  %v2678_v39 = vunpack.i.l.bf16 %v2677_v37 }
  0xb2   :  { %v459_v40 = vsel %vm454_vm3, %v434_v30, %v2673_v34  ;;  %v460_v41 = vsel %vm454_vm3, %v435_v31, %v2674_v33 }
  0xb3   :  { %v509_v42 = vpack.c.bf16 %v2679_v38, %v2678_v39  ;;  %v2682_v5 = vpop.permute.xlu0 %2681  ;;  %v484_v45 = vsel %vm479_vm4, %v459_v40, %v2678_v39  ;;  %v485_v4 = vsel %vm479_vm4, %v460_v41, %v2679_v38 }
  0xb4   :  { %v2684_v46 = vunpack.i.h.bf16 %v2682_v5  ;;  %v2683_v47 = vunpack.i.l.bf16 %v2682_v5  ;;  %v2687_v50 = vpop.permute.xlu1 %2686  ;;  %v508_v0 = vpack.c.bf16 %v485_v4, %v484_v45 }
  0xb5   :  { %v2689_v51 = vunpack.i.h.bf16 %v2687_v50  ;;  %v2688_v54 = vunpack.i.l.bf16 %v2687_v50  ;;  %2336 = vmatprep.mubr.msk.bf16.mxu0 %vm634_vm5, %v509_v42 }
  0xb6   :  { %v412_v55 = vsel %vm404_vm1, %v3230_v10, %v2684_v46  ;;  %v411_v58 = vsel %vm404_vm1, %v3225_v9, %v2683_v47 }
  0xb7   :  { %v436_v59 = vsel %vm429_vm2, %v411_v58, %v2688_v54  ;;  %v437_v62 = vsel %vm429_vm2, %v412_v55, %v2689_v51  ;;  %v2692_v63 = vpop.permute.xlu0 %2691  ;;  %731 = vmatmul.mubr.bf16.gmra.mrb[8].mxu0 %v508_v0 }
  0xb8   :  { %v2694_v3 = vunpack.i.h.bf16 %v2692_v63  ;;  %v2693_v6 = vunpack.i.l.bf16 %v2692_v63  ;;  %v2697_v7 = vpop.permute.xlu1 %2696 }
  0xb9   :  { %v2699_v8 = vunpack.i.h.bf16 %v2697_v7  ;;  %v2698_v11 = vunpack.i.l.bf16 %v2697_v7 }
  0xba   :  { %v461_v12 = vsel %vm454_vm3, %v436_v59, %v2693_v6  ;;  %v462_v13 = vsel %vm454_vm3, %v437_v62, %v2694_v3 }
  0xbb   :  { %v511_v14 = vpack.c.bf16 %v2699_v8, %v2698_v11  ;;  %v2702_v10 = vpop.permute.xlu0 %2701  ;;  %v486_v15 = vsel %vm479_vm4, %v461_v12, %v2698_v11  ;;  %v487_v9 = vsel %vm479_vm4, %v462_v13, %v2699_v8 }
  0xbc   :  { %v2704_v16 = vunpack.i.h.bf16 %v2702_v10  ;;  %v2703_v2 = vunpack.i.l.bf16 %v2702_v10  ;;  %v2707_v17 = vpop.permute.xlu1 %2706  ;;  %v510_v1 = vpack.c.bf16 %v487_v9, %v486_v15 }
  0xbd   :  { %v2709_v18 = vunpack.i.h.bf16 %v2707_v17  ;;  %v2708_v20 = vunpack.i.l.bf16 %v2707_v17  ;;  %2337 = vmatprep.mubr.msk.bf16.mxu0 %vm634_vm5, %v511_v14 }
  0xbe   :  { %v414_v22 = vsel %vm404_vm1, %v3270_v21, %v2704_v16  ;;  %v413_v23 = vsel %vm404_vm1, %v3262_v19, %v2703_v2 }
  0xbf   :  { %v438_v24 = vsel %vm429_vm2, %v413_v23, %v2708_v20  ;;  %v439_v25 = vsel %vm429_vm2, %v414_v22, %v2709_v18  ;;  %v2712_v26 = vpop.permute.xlu0 %2711  ;;  %741 = vmatmul.mubr.bf16.gmra.mrb[12].mxu0 %v510_v1 }
  0xc0   :  { %v2714_v28 = vunpack.i.h.bf16 %v2712_v26  ;;  %v2713_v30 = vunpack.i.l.bf16 %v2712_v26  ;;  %v2717_v31 = vpop.permute.xlu1 %2716 }
  0xc1   :  { %v2719_v32 = vunpack.i.h.bf16 %v2717_v31  ;;  %v2718_v33 = vunpack.i.l.bf16 %v2717_v31 }
  0xc2   :  { %v463_v34 = vsel %vm454_vm3, %v438_v24, %v2713_v30  ;;  %v464_v37 = vsel %vm454_vm3, %v439_v25, %v2714_v28 }
  0xc3   :  { %v513_v38 = vpack.c.bf16 %v2719_v32, %v2718_v33  ;;  %v2722_v21 = vpop.permute.xlu0 %2721  ;;  %v488_v39 = vsel %vm479_vm4, %v463_v34, %v2718_v33  ;;  %v489_v19 = vsel %vm479_vm4, %v464_v37, %v2719_v32 }
  0xc4   :  { %v2724_v40 = vunpack.i.h.bf16 %v2722_v21  ;;  %v2723_v41 = vunpack.i.l.bf16 %v2722_v21  ;;  %v2727_v42 = vpop.permute.xlu1 %2726  ;;  %v512_v5 = vpack.c.bf16 %v489_v19, %v488_v39 }
  0xc5   :  { %v2729_v45 = vunpack.i.h.bf16 %v2727_v42  ;;  %v2728_v4 = vunpack.i.l.bf16 %v2727_v42  ;;  %2338 = vmatprep.mubr.msk.bf16.mxu0 %vm634_vm5, %v513_v38 }
  0xc6   :  { %v416_v46 = vsel %vm404_vm1, %v3299_v29, %v2724_v40  ;;  %v415_v47 = vsel %vm404_vm1, %v3290_v27, %v2723_v41 }
  0xc7   :  { %v440_v50 = vsel %vm429_vm2, %v415_v47, %v2728_v4  ;;  %v441_v0 = vsel %vm429_vm2, %v416_v46, %v2729_v45  ;;  %v2732_v51 = vpop.permute.xlu0 %2731  ;;  %751 = vmatmul.mubr.bf16.gmra.mrb[16].mxu0 %v512_v5 }
  0xc8   :  { %v2734_v54 = vunpack.i.h.bf16 %v2732_v51  ;;  %v2733_v55 = vunpack.i.l.bf16 %v2732_v51  ;;  %v2737_v58 = vpop.permute.xlu1 %2736 }
  0xc9   :  { %v2739_v59 = vunpack.i.h.bf16 %v2737_v58  ;;  %v2738_v62 = vunpack.i.l.bf16 %v2737_v58 }
  0xca   :  { %v465_v63 = vsel %vm454_vm3, %v440_v50, %v2733_v55  ;;  %v466_v3 = vsel %vm454_vm3, %v441_v0, %v2734_v54 }
  0xcb   :  { %v515_v6 = vpack.c.bf16 %v2739_v59, %v2738_v62  ;;  %v2742_v29 = vpop.permute.xlu0 %2741  ;;  %v490_v7 = vsel %vm479_vm4, %v465_v63, %v2738_v62  ;;  %v491_v27 = vsel %vm479_vm4, %v466_v3, %v2739_v59 }
  0xcc   :  { %v2744_v8 = vunpack.i.h.bf16 %v2742_v29  ;;  %v2743_v11 = vunpack.i.l.bf16 %v2742_v29  ;;  %v2747_v12 = vpop.permute.xlu1 %2746  ;;  %v514_v13 = vpack.c.bf16 %v491_v27, %v490_v7 }
  0xcd   :  { %v2749_v14 = vunpack.i.h.bf16 %v2747_v12  ;;  %v2748_v10 = vunpack.i.l.bf16 %v2747_v12  ;;  %2339 = vmatprep.mubr.msk.bf16.mxu0 %vm634_vm5, %v515_v6 }
  0xce   :  { %v418_v15 = vsel %vm404_vm1, %v3326_v36, %v2744_v8  ;;  %v417_v9 = vsel %vm404_vm1, %v3320_v35, %v2743_v11 }
  0xcf   :  { %v442_v16 = vsel %vm429_vm2, %v417_v9, %v2748_v10  ;;  %v443_v2 = vsel %vm429_vm2, %v418_v15, %v2749_v14  ;;  %v2752_v17 = vpop.permute.xlu0 %2751  ;;  %761 = vmatmul.mubr.bf16.gmra.mrb[20].mxu0 %v514_v13 }
  0xd0   :  { %v2754_v1 = vunpack.i.h.bf16 %v2752_v17  ;;  %v2753_v18 = vunpack.i.l.bf16 %v2752_v17  ;;  %v2757_v20 = vpop.permute.xlu1 %2756 }
  0xd1   :  { %v2759_v22 = vunpack.i.h.bf16 %v2757_v20  ;;  %v2758_v23 = vunpack.i.l.bf16 %v2757_v20 }
  0xd2   :  { %v467_v24 = vsel %vm454_vm3, %v442_v16, %v2753_v18  ;;  %v468_v25 = vsel %vm454_vm3, %v443_v2, %v2754_v1 }
  0xd3   :  { %v517_v26 = vpack.c.bf16 %v2759_v22, %v2758_v23  ;;  %v2762_v36 = vpop.permute.xlu0 %2761  ;;  %v492_v28 = vsel %vm479_vm4, %v467_v24, %v2758_v23  ;;  %v493_v35 = vsel %vm479_vm4, %v468_v25, %v2759_v22 }
  0xd4   :  { %v2764_v30 = vunpack.i.h.bf16 %v2762_v36  ;;  %v2763_v31 = vunpack.i.l.bf16 %v2762_v36  ;;  %v2767_v32 = vpop.permute.xlu1 %2766  ;;  %v516_v33 = vpack.c.bf16 %v493_v35, %v492_v28 }
  0xd5   :  { %v2769_v34 = vunpack.i.h.bf16 %v2767_v32  ;;  %v2768_v37 = vunpack.i.l.bf16 %v2767_v32  ;;  %2340 = vmatprep.mubr.msk.bf16.mxu0 %vm634_vm5, %v517_v26 }
  0xd6   :  { %v420_v38 = vsel %vm404_vm1, %v3356_v44, %v2764_v30  ;;  %v419_v21 = vsel %vm404_vm1, %v3350_v43, %v2763_v31 }
  0xd7   :  { %v444_v39 = vsel %vm429_vm2, %v419_v21, %v2768_v37  ;;  %v445_v19 = vsel %vm429_vm2, %v420_v38, %v2769_v34  ;;  %v2772_v40 = vpop.permute.xlu0 %2771  ;;  %771 = vmatmul.mubr.bf16.gmra.mrb[24].mxu0 %v516_v33 }
  0xd8   :  { %v2774_v41 = vunpack.i.h.bf16 %v2772_v40  ;;  %v2773_v42 = vunpack.i.l.bf16 %v2772_v40  ;;  %v2777_v5 = vpop.permute.xlu1 %2776 }
  0xd9   :  { %v2779_v45 = vunpack.i.h.bf16 %v2777_v5  ;;  %v2778_v4 = vunpack.i.l.bf16 %v2777_v5 }
  0xda   :  { %v469_v46 = vsel %vm454_vm3, %v444_v39, %v2773_v42  ;;  %v470_v47 = vsel %vm454_vm3, %v445_v19, %v2774_v41 }
  0xdb   :  { %v519_v50 = vpack.c.bf16 %v2779_v45, %v2778_v4  ;;  %v2782_v44 = vpop.permute.xlu0 %2781  ;;  %v494_v0 = vsel %vm479_vm4, %v469_v46, %v2778_v4  ;;  %v495_v43 = vsel %vm479_vm4, %v470_v47, %v2779_v45 }
  0xdc   :  { %v2784_v51 = vunpack.i.h.bf16 %v2782_v44  ;;  %v2783_v54 = vunpack.i.l.bf16 %v2782_v44  ;;  %v2787_v55 = vpop.permute.xlu1 %2786  ;;  %v518_v58 = vpack.c.bf16 %v495_v43, %v494_v0 }
  0xdd   :  { %v2789_v59 = vunpack.i.h.bf16 %v2787_v55  ;;  %v2788_v62 = vunpack.i.l.bf16 %v2787_v55  ;;  %2341 = vmatprep.mubr.msk.bf16.mxu0 %vm634_vm5, %v519_v50 }
  0xde   :  { %v422_v63 = vsel %vm404_vm1, %v3374_v49, %v2784_v51  ;;  %v421_v3 = vsel %vm404_vm1, %v3368_v48, %v2783_v54 }
  0xdf   :  { %v446_v6 = vsel %vm429_vm2, %v421_v3, %v2788_v62  ;;  %v447_v29 = vsel %vm429_vm2, %v422_v63, %v2789_v59  ;;  %v2792_v7 = vpop.permute.xlu0 %2791  ;;  %781 = vmatmul.mubr.bf16.gmra.mrb[28].mxu0 %v518_v58 }
  0xe0   :  { %v2794_v27 = vunpack.i.h.bf16 %v2792_v7  ;;  %v2793_v8 = vunpack.i.l.bf16 %v2792_v7  ;;  %v2797_v11 = vpop.permute.xlu1 %2796 }
  0xe1   :  { %v2799_v12 = vunpack.i.h.bf16 %v2797_v11  ;;  %v2798_v13 = vunpack.i.l.bf16 %v2797_v11 }
  0xe2   :  { %v471_v14 = vsel %vm454_vm3, %v446_v6, %v2793_v8  ;;  %v472_v10 = vsel %vm454_vm3, %v447_v29, %v2794_v27 }
  0xe3   :  { %v521_v15 = vpack.c.bf16 %v2799_v12, %v2798_v13  ;;  %v2802_v49 = vpop.permute.xlu0 %2801  ;;  %v496_v9 = vsel %vm479_vm4, %v471_v14, %v2798_v13  ;;  %v497_v48 = vsel %vm479_vm4, %v472_v10, %v2799_v12 }
  0xe4   :  { %v2804_v16 = vunpack.i.h.bf16 %v2802_v49  ;;  %v2803_v2 = vunpack.i.l.bf16 %v2802_v49  ;;  %v2807_v17 = vpop.permute.xlu1 %2806  ;;  %v520_v1 = vpack.c.bf16 %v497_v48, %v496_v9 }
  0xe5   :  { %v2809_v18 = vunpack.i.h.bf16 %v2807_v17  ;;  %v2808_v20 = vunpack.i.l.bf16 %v2807_v17  ;;  %2342 = vmatprep.mubr.msk.bf16.mxu0 %vm634_vm5, %v521_v15  ;;  %v2892_v17 = vld [vmem:[#allocation2 + $0x90] ss:$8 sps:$4 sm:$0xff]  }
  0xe6   :  { %v424_v22 = vsel %vm404_vm1, %v3392_v53, %v2804_v16  ;;  %v423_v23 = vsel %vm404_vm1, %v3386_v52, %v2803_v2  ;;  %v2890_v16 = vld [vmem:[#allocation2 + $0x94] ss:$8 sps:$4 sm:$0xff]  }
  0xe7   :  { %v448_v24 = vsel %vm429_vm2, %v423_v23, %v2808_v20  ;;  %v449_v25 = vsel %vm429_vm2, %v424_v22, %v2809_v18  ;;  %791 = vmatmul.mubr.bf16.gmra.mrb[32].mxu0 %v520_v1  ;;  %v2812_v26 = vpop.permute.xlu0 %2811  ;;  %1021 = vmatprep.subr.bf16.mxu1 %v2890_v16  ;;  %v2893_v18 = vld [vmem:[#allocation2 + $0xa4] ss:$8 sps:$4 sm:$0xff]   ;;  %v2895_v20 = vld [vmem:[#allocation2 + $0xa0] ss:$8 sps:$4 sm:$0xff]   ;;  %v2896_v22 = vld [vmem:[#allocation2 + $0xb4] ss:$8 sps:$4 sm:$0xff]  }
  0xe8   :  { %v2814_v36 = vunpack.i.h.bf16 %v2812_v26  ;;  %v2813_v28 = vunpack.i.l.bf16 %v2812_v26  ;;  %v2817_v35 = vpop.permute.xlu1 %2816  ;;  %1022 = vmatpush1.bf16.msra.mxu1 %v2892_v17  ;;  %v2898_v23 = vld [vmem:[#allocation2 + $0xb0] ss:$8 sps:$4 sm:$0xff]   ;;  %v2902_v26 = vld [vmem:[#allocation2 + $0xd4] ss:$8 sps:$4 sm:$0xff]   ;;  %v2917_v17 = vld [vmem:[#allocation2 + $0x20] ss:$8 sps:$4 sm:$0xff]  }
  0xe9   :  { %v2819_v30 = vunpack.i.h.bf16 %v2817_v35  ;;  %v2818_v31 = vunpack.i.l.bf16 %v2817_v35  ;;  %1023 = vmatprep.subr.bf16.mxu1 %v2893_v18  ;;  %v2907_v35 = vld [vmem:[#allocation2 + $0xe0] ss:$8 sps:$4 sm:$0xff]   ;;  %v2922_v18 = vld [vmem:[#allocation2 + $0x34] ss:$8 sps:$4 sm:$0xff]  }
  0xea   :  { %v473_v32 = vsel %vm454_vm3, %v448_v24, %v2813_v28  ;;  %v474_v33 = vsel %vm454_vm3, %v449_v25, %v2814_v36  ;;  %v2899_v24 = vld [vmem:[#allocation2 + $0xc4] ss:$8 sps:$4 sm:$0xff]   ;;  %v2901_v25 = vld [vmem:[#allocation2 + $0xc0] ss:$8 sps:$4 sm:$0xff]   ;;  %v2904_v36 = vld [vmem:[#allocation2 + $0xd0] ss:$8 sps:$4 sm:$0xff]  }
  0xeb   :  { %v523_v34 = vpack.c.bf16 %v2819_v30, %v2818_v31  ;;  %v498_v53 = vsel %vm479_vm4, %v473_v32, %v2818_v31  ;;  %v499_v52 = vsel %vm479_vm4, %v474_v33, %v2819_v30  ;;  %v2822_v37 = vpop.permute.xlu0 %2821  ;;  %v2905_v28 = vld [vmem:[#allocation2 + $0xe4] ss:$8 sps:$4 sm:$0xff]   ;;  %v2908_v30 = vld [vmem:[#allocation2 + $0xf4] ss:$8 sps:$4 sm:$0xff]   ;;  %v2910_v31 = vld [vmem:[#allocation2 + $0xf0] ss:$8 sps:$4 sm:$0xff]  }
  0xec   :  { %v522_v38 = vpack.c.bf16 %v499_v52, %v498_v53  ;;  %v2824_v21 = vunpack.i.h.bf16 %v2822_v37  ;;  %v2823_v39 = vunpack.i.l.bf16 %v2822_v37  ;;  %v2827_v19 = vpop.permute.xlu1 %2826  ;;  %1024 = vmatpush1.bf16.msra.mxu1 %v2895_v20  ;;  %v3109_v32 = vmov 0   ;;  %v2913_v33 = vld [vmem:[#allocation2 + $0x4] ss:$8 sps:$4 sm:$0xff]  }
  0xed   :  { %2343 = vmatprep.mubr.msk.bf16.mxu0 %vm634_vm5, %v523_v34  ;;  %v2829_v40 = vunpack.i.h.bf16 %v2827_v19  ;;  %v2828_v41 = vunpack.i.l.bf16 %v2827_v19  ;;  %1025 = vmatprep.subr.bf16.mxu1 %v2896_v22 }
  0xee   :  { %v426_v42 = vsel %vm404_vm1, %v3410_v57, %v2824_v21  ;;  %v425_v5 = vsel %vm404_vm1, %v3404_v56, %v2823_v39  ;;  %1051 = vmatprep.mubr.bf16.mxu1 %v3109_v32 }
  0xef   :  { %801 = vmatmul.mubr.bf16.gmra.mrb[36].mxu0 %v522_v38  ;;  %v450_v45 = vsel %vm429_vm2, %v425_v5, %v2828_v41  ;;  %v451_v4 = vsel %vm429_vm2, %v426_v42, %v2829_v40  ;;  %v2832_v46 = vpop.permute.xlu0 %2831  ;;  %v3598_v5 = vld [vmem:[%s3780_s2] ss:$0 sm:$0xff] }
  0xf0   :  { %v2834_v47 = vunpack.i.h.bf16 %v2832_v46  ;;  %v2833_v50 = vunpack.i.l.bf16 %v2832_v46  ;;  %v2837_v44 = vpop.permute.xlu1 %2836  ;;  %1026 = vmatpush1.bf16.msra.mxu1 %v2898_v23  ;;  %v2920_v23 = vld [vmem:[#allocation2 + $0x30] ss:$8 sps:$4 sm:$0xff]  }
  0xf1   :  { %v2839_v0 = vunpack.i.h.bf16 %v2837_v44  ;;  %v2838_v43 = vunpack.i.l.bf16 %v2837_v44  ;;  %1027 = vmatprep.subr.bf16.mxu1 %v2899_v24 }
  0xf2   :  { %v475_v51 = vsel %vm454_vm3, %v450_v45, %v2833_v50  ;;  %v476_v54 = vsel %vm454_vm3, %v451_v4, %v2834_v47 }
  0xf3   :  { %v525_v55 = vpack.c.bf16 %v2839_v0, %v2838_v43  ;;  %v500_v57 = vsel %vm479_vm4, %v475_v51, %v2838_v43  ;;  %v501_v56 = vsel %vm479_vm4, %v476_v54, %v2839_v0  ;;  %v2842_v58 = vpop.permute.xlu0 %2841 }
  0xf4   :  { %v524_v59 = vpack.c.bf16 %v501_v56, %v500_v57  ;;  %v2844_v62 = vunpack.i.h.bf16 %v2842_v58  ;;  %v2843_v63 = vunpack.i.l.bf16 %v2842_v58  ;;  %v2847_v3 = vpop.permute.xlu1 %2846  ;;  %1028 = vmatpush1.bf16.msra.mxu1 %v2901_v25 }
  0xf5   :  { %2344 = vmatprep.mubr.msk.bf16.mxu0 %vm634_vm5, %v525_v55  ;;  %v2849_v6 = vunpack.i.h.bf16 %v2847_v3  ;;  %v2848_v29 = vunpack.i.l.bf16 %v2847_v3  ;;  %1029 = vmatprep.subr.bf16.mxu1 %v2902_v26  ;;  %v2925_v26 = vld [vmem:[#allocation2 + $0x44] ss:$8 sps:$4 sm:$0xff]  }
  0xf6   :  { %v428_v7 = vsel %vm404_vm1, %v3428_v61, %v2844_v62  ;;  %v427_v27 = vsel %vm404_vm1, %v3422_v60, %v2843_v63 }
  0xf7   :  { %811 = vmatmul.mubr.bf16.gmra.mrb[40].mxu0 %v524_v59  ;;  %v452_v8 = vsel %vm429_vm2, %v427_v27, %v2848_v29  ;;  %v453_v11 = vsel %vm429_vm2, %v428_v7, %v2849_v6  ;;  %v2852_v12 = vpop.permute.xlu0 %2851 }
  0xf8   :  { %v2854_v13 = vunpack.i.h.bf16 %v2852_v12  ;;  %v2853_v14 = vunpack.i.l.bf16 %v2852_v12  ;;  %v2857_v10 = vpop.permute.xlu1 %2856  ;;  %1030 = vmatpush1.bf16.msra.mxu1 %v2904_v36 }
  0xf9   :  { %v2859_v15 = vunpack.i.h.bf16 %v2857_v10  ;;  %v2858_v49 = vunpack.i.l.bf16 %v2857_v10  ;;  %1031 = vmatprep.subr.bf16.mxu1 %v2905_v28  ;;  %v2914_v10 = vld [vmem:[#allocation2 + $0x10] ss:$8 sps:$4 sm:$0xff]  }
  0xfa   :  { %v477_v9 = vsel %vm454_vm3, %v452_v8, %v2853_v14  ;;  %v478_v48 = vsel %vm454_vm3, %v453_v11, %v2854_v13  ;;  %v2911_v8 = vld [vmem:[#allocation2] ss:$8 sps:$4 sm:$0xff]   ;;  %v2916_v13 = vld [vmem:[#allocation2 + $0x14] ss:$8 sps:$4 sm:$0xff]  }
  0xfb   :  { %v527_v61 = vpack.c.bf16 %v2859_v15, %v2858_v49  ;;  %v502_v2 = vsel %vm479_vm4, %v477_v9, %v2858_v49  ;;  %v503_v60 = vsel %vm479_vm4, %v478_v48, %v2859_v15  ;;  %v2919_v9 = vld [vmem:[#allocation2 + $0x24] ss:$8 sps:$4 sm:$0xff]  }
  0xfc   :  { %v526_v1 = vpack.c.bf16 %v503_v60, %v502_v2  ;;  %1032 = vmatpush1.bf16.msra.mxu1 %v2907_v35 }
  0xfd   :  { %2345 = vmatprep.mubr.msk.bf16.mxu0 %vm634_vm5, %v527_v61  ;;  %1033 = vmatprep.subr.bf16.mxu1 %v2908_v30 }
  0xff   :  { %821 = vmatmul.mubr.bf16.gmra.mrb[44].mxu0 %v526_v1 }
 0x100   :  { %1034 = vmatpush1.bf16.msra.mxu1 %v2910_v31 }
 0x101   :  { %1172 = vmatprep.subr.bf16.mxu1 %v2913_v33  ;;  %v2923_v33 = vld [vmem:[#allocation2 + $0x40] ss:$8 sps:$4 sm:$0xff]  }
 0x17a   :  { %v712_v34 = vpop.f32.mrb[0].mxu0 }
 0x17b   :  { %v714_v53 = vpop.f32.mrb[1].mxu0 }
 0x17c   :  { %v831_v52 = vmax.f32 %v712_v34, %v714_v53  ;;  %v716_v37 = vpop.f32.mrb[2].mxu0 }
 0x17d   :  { %v718_v38 = vpop.f32.mrb[3].mxu0 }
 0x17e   :  { %v832_v21 = vmax.f32 %v716_v37, %v718_v38  ;;  %v2926_v38 = vld [vmem:[#allocation2 + $0x50] ss:$8 sps:$4 sm:$0xff]  }
 0x180   :  { %v855_v39 = vmax.f32 %v831_v52, %v832_v21  ;;  %v2928_v52 = vld [vmem:[#allocation2 + $0x54] ss:$8 sps:$4 sm:$0xff]  }
 0x182   :  { %v722_v19 = vpop.f32.mrb[4].mxu0  ;;  %v874_v46 = vadd.f32 %v3598_v5, %v855_v39 }
 0x183   :  { %v724_v40 = vpop.f32.mrb[5].mxu0 }
 0x184   :  { %v833_v41 = vmax.f32 %v722_v19, %v724_v40  ;;  %v726_v42 = vpop.f32.mrb[6].mxu0  ;;  %v886_v43 = vmax.f32 %v874_v46, 0.0  ;;  %v2931_v19 = vld [vmem:[#allocation2 + $0x64] ss:$8 sps:$4 sm:$0xff]   ;;  %v2929_v46 = vld [vmem:[#allocation2 + $0x60] ss:$8 sps:$4 sm:$0xff]  }
 0x185   :  { %v728_v45 = vpop.f32.mrb[7].mxu0 }
 0x186   :  { %v834_v4 = vmax.f32 %v726_v42, %v728_v45 }
 0x188   :  { %v856_v47 = vmax.f32 %v833_v41, %v834_v4 }
 0x18a   :  { %v875_v50 = vadd.f32 %v3598_v5, %v856_v47  ;;  %v732_v44 = vpop.f32.mrb[8].mxu0 }
 0x18b   :  { %v734_v0 = vpop.f32.mrb[9].mxu0 }
 0x18c   :  { %v887_v51 = vmax.f32 %v875_v50, 0.0  ;;  %v835_v54 = vmax.f32 %v732_v44, %v734_v0  ;;  %v736_v55 = vpop.f32.mrb[10].mxu0  ;;  %v2934_v50 = vld [vmem:[#allocation2 + $0x74] ss:$8 sps:$4 sm:$0xff]  }
 0x18d   :  { %v738_v57 = vpop.f32.mrb[11].mxu0 }
 0x18e   :  { %v3602_v56 = vpack.c.bf16 %v887_v51, %v886_v43  ;;  %v836_v58 = vmax.f32 %v736_v55, %v738_v57  ;;  %v2932_v43 = vld [vmem:[#allocation2 + $0x70] ss:$8 sps:$4 sm:$0xff]   ;;  %v2937_v55 = vld [vmem:[#allocation2 + $0x104] ss:$8 sps:$4 sm:$0xff]  }
 0x190   :  { %v857_v59 = vmax.f32 %v835_v54, %v836_v58 }
 0x192   :  { %v876_v62 = vadd.f32 %v3598_v5, %v857_v59  ;;  %v742_v63 = vpop.f32.mrb[12].mxu0 }
 0x193   :  { %v744_v3 = vpop.f32.mrb[13].mxu0 }
 0x194   :  { %v888_v6 = vmax.f32 %v876_v62, 0.0  ;;  %v837_v29 = vmax.f32 %v742_v63, %v744_v3  ;;  %v746_v7 = vpop.f32.mrb[14].mxu0 }
 0x195   :  { %v748_v27 = vpop.f32.mrb[15].mxu0 }
 0x196   :  { %v838_v11 = vmax.f32 %v746_v7, %v748_v27  ;;  %v918_v12 = vpack.c.bf16 %v888_v6, %v887_v51 }
 0x198   :  { %v858_v14 = vmax.f32 %v837_v29, %v838_v11  ;;  %1052 = vmatmul.mubr.bf16.vlgmr.msra.gmra.mrb[0].mxu1 %v918_v12 }
 0x199   :  { %1061 = vmatprep.mubr.bf16.mxu1 %v3109_v32  ;;  %1173 = vmatpush1.bf16.msra.mxu1 %v2911_v8 }
 0x19a   :  { %v877_v15 = vadd.f32 %v3598_v5, %v858_v14  ;;  %v752_v49 = vpop.f32.mrb[16].mxu0  ;;  %1174 = vmatprep.subr.bf16.mxu1 %v2916_v13 }
 0x19b   :  { %v754_v48 = vpop.f32.mrb[17].mxu0 }
 0x19c   :  { %v889_v16 = vmax.f32 %v877_v15, 0.0  ;;  %v839_v61 = vmax.f32 %v752_v49, %v754_v48  ;;  %v756_v2 = vpop.f32.mrb[18].mxu0 }
 0x19d   :  { %v758_v60 = vpop.f32.mrb[19].mxu0  ;;  %1175 = vmatpush1.bf16.msra.mxu1 %v2914_v10 }
 0x19e   :  { %v840_v1 = vmax.f32 %v756_v2, %v758_v60  ;;  %1176 = vmatprep.subr.bf16.mxu1 %v2919_v9  ;;  %v3607_v20 = vpack.c.bf16 %v889_v16, %v888_v6 }
 0x1a0   :  { %v859_v22 = vmax.f32 %v839_v61, %v840_v1 }
 0x1a1   :  { %1177 = vmatpush1.bf16.msra.mxu1 %v2917_v17 }
 0x1a2   :  { %v878_v24 = vadd.f32 %v3598_v5, %v859_v22  ;;  %v762_v25 = vpop.f32.mrb[20].mxu0  ;;  %1178 = vmatprep.subr.bf16.mxu1 %v2922_v18 }
 0x1a3   :  { %v764_v36 = vpop.f32.mrb[21].mxu0 }
 0x1a4   :  { %v890_v28 = vmax.f32 %v878_v24, 0.0  ;;  %v841_v35 = vmax.f32 %v762_v25, %v764_v36  ;;  %v766_v30 = vpop.f32.mrb[22].mxu0  ;;  %v3008_v24 = vld [vmem:[%s3783_s5] sm:$0xff]   ;;  %v3009_v25 = vld [vmem:[%s3783_s5 + $0x48] sm:$0xff]  }
 0x1a5   :  { %v768_v31 = vpop.f32.mrb[23].mxu0  ;;  %1179 = vmatpush1.bf16.msra.mxu1 %v2920_v23  ;;  %v3007_v23 = vld [vmem:[%s3783_s5 + $0x40] sm:$0xff]  }
 0x1a6   :  { %v842_v34 = vmax.f32 %v766_v30, %v768_v31  ;;  %v3610_v53 = vpack.c.bf16 %v890_v28, %v889_v16  ;;  %1180 = vmatprep.subr.bf16.mxu1 %v2925_v26  ;;  %2470 = vmatprep.subr.bf16.mxu0 %v3007_v23  ;;  %v2965_v23 = vld [vmem:[#allocation2 + $0x1a0] ss:$8 sps:$4 sm:$0xff]  }
 0x1a7   :  { %2471 = vmatpush3.bf16.msra.mxu0 %v3008_v24  ;;  %v2970_v24 = vld [vmem:[#allocation2 + $0x1b4] ss:$8 sps:$4 sm:$0xff]  }
 0x1a8   :  { %v860_v37 = vmax.f32 %v841_v35, %v842_v34  ;;  %1062 = vmatmul.mubr.bf16.gmra.mrb[4].mxu1 %v3610_v53  ;;  %v3010_v35 = vld [vmem:[%s3783_s5 + $0x8] sm:$0xff]   ;;  %2472 = vmatprep.subr.bf16.mxu0 %v3009_v25  ;;  %v3011_v34 = vld [vmem:[%s3783_s5 + $0x50] sm:$0xff]  }
 0x1a9   :  { %1071 = vmatprep.mubr.bf16.mxu1 %v3109_v32  ;;  %1181 = vmatpush1.bf16.msra.mxu1 %v2923_v33  ;;  %v2968_v25 = vld [vmem:[#allocation2 + $0x1b0] ss:$8 sps:$4 sm:$0xff]  }
 0x1aa   :  { %v879_v21 = vadd.f32 %v3598_v5, %v860_v37  ;;  %v772_v39 = vpop.f32.mrb[24].mxu0  ;;  %1182 = vmatprep.subr.bf16.mxu1 %v2928_v52  ;;  %v2935_v52 = vld [vmem:[#allocation2 + $0x100] ss:$8 sps:$4 sm:$0xff]  }
 0x1ab   :  { %v774_v40 = vpop.f32.mrb[25].mxu0  ;;  %2473 = vmatpush3.bf16.msra.mxu0 %v3010_v35  ;;  %v2979_v35 = vld [vmem:[#allocation2 + $0x1e4] ss:$8 sps:$4 sm:$0xff]  }
 0x1ac   :  { %v891_v41 = vmax.f32 %v879_v21, 0.0  ;;  %v843_v42 = vmax.f32 %v772_v39, %v774_v40  ;;  %v776_v45 = vpop.f32.mrb[26].mxu0  ;;  %2474 = vmatprep.subr.bf16.mxu0 %v3011_v34  ;;  %v2985_v34 = vld [vmem:[#allocation2 + $0x204] ss:$8 sps:$4 sm:$0xff]  }
 0x1ad   :  { %v778_v4 = vpop.f32.mrb[27].mxu0  ;;  %1183 = vmatpush1.bf16.msra.mxu1 %v2926_v38  ;;  %v2940_v38 = vld [vmem:[#allocation2 + $0x114] ss:$8 sps:$4 sm:$0xff]  }
 0x1ae   :  { %v844_v47 = vmax.f32 %v776_v45, %v778_v4  ;;  %1184 = vmatprep.subr.bf16.mxu1 %v2931_v19  ;;  %v3615_v44 = vpack.c.bf16 %v891_v41, %v890_v28  ;;  %v3012_v19 = vld [vmem:[%s3783_s5 + $0x10] sm:$0xff]   ;;  %v2943_v45 = vld [vmem:[#allocation2 + $0x124] ss:$8 sps:$4 sm:$0xff]  }
 0x1af   :  { %2475 = vmatpush3.bf16.msra.mxu0 %v3012_v19  ;;  %v2989_v19 = vld [vmem:[#allocation2 + $0x220] ss:$8 sps:$4 sm:$0xff]  }
 0x1b0   :  { %v861_v0 = vmax.f32 %v843_v42, %v844_v47  ;;  %v2938_v42 = vld [vmem:[#allocation2 + $0x110] ss:$8 sps:$4 sm:$0xff]  }
 0x1b1   :  { %1185 = vmatpush1.bf16.msra.mxu1 %v2929_v46 }
 0x1b2   :  { %v880_v51 = vadd.f32 %v3598_v5, %v861_v0  ;;  %v782_v54 = vpop.f32.mrb[28].mxu0  ;;  %1186 = vmatprep.subr.bf16.mxu1 %v2934_v50 }
 0x1b3   :  { %v784_v57 = vpop.f32.mrb[29].mxu0 }
 0x1b4   :  { %v892_v58 = vmax.f32 %v880_v51, 0.0  ;;  %v845_v59 = vmax.f32 %v782_v54, %v784_v57  ;;  %v786_v62 = vpop.f32.mrb[30].mxu0  ;;  %v3015_v51 = vld [vmem:[%s3783_s5 + $0x60] sm:$0xff]   ;;  %v2946_v57 = vld [vmem:[#allocation2 + $0x134] ss:$8 sps:$4 sm:$0xff]  }
 0x1b5   :  { %v788_v63 = vpop.f32.mrb[31].mxu0  ;;  %1187 = vmatpush1.bf16.msra.mxu1 %v2932_v43  ;;  %v2941_v54 = vld [vmem:[#allocation2 + $0x120] ss:$8 sps:$4 sm:$0xff]  }
 0x1b6   :  { %v846_v3 = vmax.f32 %v786_v62, %v788_v63  ;;  %v3618_v6 = vpack.c.bf16 %v892_v58, %v891_v41  ;;  %1343 = vmatprep.subr.bf16.mxu1 %v2937_v55  ;;  %v3013_v41 = vld [vmem:[%s3783_s5 + $0x58] sm:$0xff]   ;;  %v3016_v62 = vld [vmem:[%s3783_s5 + $0x20] sm:$0xff]  }
 0x1b7   :  { %2476 = vmatprep.subr.bf16.mxu0 %v3013_v41  ;;  %v2992_v41 = vld [vmem:[#allocation2 + $0x230] ss:$8 sps:$4 sm:$0xff]  }
 0x1b8   :  { %v862_v29 = vmax.f32 %v845_v59, %v846_v3  ;;  %1072 = vmatmul.mubr.bf16.gmra.mrb[8].mxu1 %v3618_v6  ;;  %v3017_v3 = vld [vmem:[%s3783_s5 + $0x68] sm:$0xff]  }
 0x1b9   :  { %1081 = vmatprep.mubr.bf16.mxu1 %v3109_v32 }
 0x1ba   :  { %v881_v7 = vadd.f32 %v3598_v5, %v862_v29  ;;  %v792_v27 = vpop.f32.mrb[32].mxu0  ;;  %v2944_v29 = vld [vmem:[#allocation2 + $0x130] ss:$8 sps:$4 sm:$0xff]  }
 0x1bb   :  { %v794_v8 = vpop.f32.mrb[33].mxu0 }
 0x1bc   :  { %v893_v11 = vmax.f32 %v881_v7, 0.0  ;;  %v847_v12 = vmax.f32 %v792_v27, %v794_v8  ;;  %v796_v13 = vpop.f32.mrb[34].mxu0  ;;  %v2949_v7 = vld [vmem:[#allocation2 + $0x144] ss:$8 sps:$4 sm:$0xff]  }
 0x1bd   :  { %v798_v14 = vpop.f32.mrb[35].mxu0  ;;  %v3018_v8 = vld [vmem:[%s3783_s5 + $0x28] sm:$0xff]  }
 0x1be   :  { %v848_v10 = vmax.f32 %v796_v13, %v798_v14  ;;  %v3623_v15 = vpack.c.bf16 %v893_v11, %v892_v58  ;;  %v2947_v13 = vld [vmem:[#allocation2 + $0x140] ss:$8 sps:$4 sm:$0xff]   ;;  %v2952_v14 = vld [vmem:[#allocation2 + $0x154] ss:$8 sps:$4 sm:$0xff]  }
 0x1c0   :  { %v863_v49 = vmax.f32 %v847_v12, %v848_v10  ;;  %v3019_v12 = vld [vmem:[%s3783_s5 + $0x70] sm:$0xff]  }
 0x1c2   :  { %v882_v9 = vadd.f32 %v3598_v5, %v863_v49  ;;  %v802_v48 = vpop.f32.mrb[36].mxu0  ;;  %v2950_v49 = vld [vmem:[#allocation2 + $0x150] ss:$8 sps:$4 sm:$0xff]  }
 0x1c3   :  { %v804_v16 = vpop.f32.mrb[37].mxu0 }
 0x1c4   :  { %v894_v61 = vmax.f32 %v882_v9, 0.0  ;;  %v849_v2 = vmax.f32 %v802_v48, %v804_v16  ;;  %v806_v60 = vpop.f32.mrb[38].mxu0  ;;  %v2955_v9 = vld [vmem:[#allocation2 + $0x164] ss:$8 sps:$4 sm:$0xff]   ;;  %v2953_v48 = vld [vmem:[#allocation2 + $0x160] ss:$8 sps:$4 sm:$0xff]  }
 0x1c5   :  { %v808_v17 = vpop.f32.mrb[39].mxu0  ;;  %v2958_v16 = vld [vmem:[#allocation2 + $0x174] ss:$8 sps:$4 sm:$0xff]  }
 0x1c6   :  { %v850_v1 = vmax.f32 %v806_v60, %v808_v17  ;;  %v3626_v18 = vpack.c.bf16 %v894_v61, %v893_v11  ;;  %v2959_v60 = vld [vmem:[#allocation2 + $0x180] ss:$8 sps:$4 sm:$0xff]   ;;  %v2964_v17 = vld [vmem:[#allocation2 + $0x194] ss:$8 sps:$4 sm:$0xff]  }
 0x1c8   :  { %v864_v22 = vmax.f32 %v849_v2, %v850_v1  ;;  %1082 = vmatmul.mubr.bf16.gmra.mrb[12].mxu1 %v3626_v18  ;;  %v2961_v2 = vld [vmem:[#allocation2 + $0x184] ss:$8 sps:$4 sm:$0xff]   ;;  %v2962_v1 = vld [vmem:[#allocation2 + $0x190] ss:$8 sps:$4 sm:$0xff]  }
 0x1c9   :  { %1204 = vmatprep.mubr.bf16.mxu1 %v3109_v32 }
 0x1ca   :  { %v883_v26 = vadd.f32 %v3598_v5, %v864_v22  ;;  %v812_v36 = vpop.f32.mrb[40].mxu0  ;;  %v2967_v22 = vld [vmem:[#allocation2 + $0x1a4] ss:$8 sps:$4 sm:$0xff]  }
 0x1cb   :  { %v814_v28 = vpop.f32.mrb[41].mxu0 }
 0x1cc   :  { %v895_v30 = vmax.f32 %v883_v26, 0.0  ;;  %v851_v31 = vmax.f32 %v812_v36, %v814_v28  ;;  %v816_v33 = vpop.f32.mrb[42].mxu0  ;;  %v2973_v26 = vld [vmem:[#allocation2 + $0x1c4] ss:$8 sps:$4 sm:$0xff]   ;;  %v2976_v36 = vld [vmem:[#allocation2 + $0x1d4] ss:$8 sps:$4 sm:$0xff]  }
 0x1cd   :  { %v818_v37 = vpop.f32.mrb[43].mxu0  ;;  %v2974_v28 = vld [vmem:[#allocation2 + $0x1d0] ss:$8 sps:$4 sm:$0xff]  }
 0x1ce   :  { %v852_v21 = vmax.f32 %v816_v33, %v818_v37  ;;  %v3646_v39 = vpack.c.bf16 %v895_v30, %v894_v61  ;;  %v2956_v61 = vld [vmem:[#allocation2 + $0x170] ss:$8 sps:$4 sm:$0xff]   ;;  %v2988_v37 = vld [vmem:[#allocation2 + $0x214] ss:$8 sps:$4 sm:$0xff]  }
 0x1cf   :  { %v2980_v33 = vld [vmem:[#allocation2 + $0x1f0] ss:$8 sps:$4 sm:$0xff]  }
 0x1d0   :  { %1205 = vmatmul.mubr.bf16.vlgmr.msra.gmra.mrb[0].mxu1 %v3602_v56  ;;  %v865_v40 = vmax.f32 %v851_v31, %v852_v21  ;;  %v3014_v56 = vld [vmem:[%s3783_s5 + $0x18] sm:$0xff]   ;;  %v2991_v21 = vld [vmem:[#allocation2 + $0x224] ss:$8 sps:$4 sm:$0xff]  }
 0x1d1   :  { %1344 = vmatpush1.bf16.msra.mxu1 %v2935_v52  ;;  %1214 = vmatprep.mubr.bf16.mxu1 %v3109_v32  ;;  %v2982_v31 = vld [vmem:[#allocation2 + $0x1f4] ss:$8 sps:$4 sm:$0xff]   ;;  %v2983_v52 = vld [vmem:[#allocation2 + $0x200] ss:$8 sps:$4 sm:$0xff]  }
 0x1d2   :  { %1345 = vmatprep.subr.bf16.mxu1 %v2940_v38  ;;  %v884_v4 = vadd.f32 %v3598_v5, %v865_v40  ;;  %v822_v46 = vpop.f32.mrb[44].mxu0  ;;  %2477 = vmatpush3.bf16.msra.mxu0 %v3014_v56  ;;  %v2986_v38 = vld [vmem:[#allocation2 + $0x210] ss:$8 sps:$4 sm:$0xff]   ;;  %v2994_v40 = vld [vmem:[#allocation2 + $0x234] ss:$8 sps:$4 sm:$0xff]  }
 0x1d3   :  { %v824_v47 = vpop.f32.mrb[45].mxu0  ;;  %2478 = vmatprep.subr.bf16.mxu0 %v3015_v51  ;;  %v3004_v56 = vld [vmem:[#allocation2 + $0x270] ss:$8 sps:$4 sm:$0xff]  }
 0x1d4   :  { %v896_v50 = vmax.f32 %v884_v4, 0.0  ;;  %v853_v0 = vmax.f32 %v822_v46, %v824_v47  ;;  %v826_v43 = vpop.f32.mrb[46].mxu0  ;;  %v2998_v4 = vld [vmem:[#allocation2 + $0x250] ss:$8 sps:$4 sm:$0xff]   ;;  %v3003_v46 = vld [vmem:[#allocation2 + $0x264] ss:$8 sps:$4 sm:$0xff]  }
 0x1d5   :  { %1346 = vmatpush1.bf16.msra.mxu1 %v2938_v42  ;;  %v828_v55 = vpop.f32.mrb[47].mxu0  ;;  %v2997_v42 = vld [vmem:[#allocation2 + $0x244] ss:$8 sps:$4 sm:$0xff]   ;;  %v3006_v47 = vld [vmem:[#allocation2 + $0x274] ss:$8 sps:$4 sm:$0xff]  }
 0x1d6   :  { %1347 = vmatprep.subr.bf16.mxu1 %v2943_v45  ;;  %v854_v58 = vmax.f32 %v826_v43, %v828_v55  ;;  %v3663_v59 = vpack.c.bf16 %v896_v50, %v895_v30  ;;  %2479 = vmatpush3.bf16.msra.mxu0 %v3016_v62  ;;  %v2977_v30 = vld [vmem:[#allocation2 + $0x1e0] ss:$8 sps:$4 sm:$0xff]   ;;  %v3000_v45 = vld [vmem:[#allocation2 + $0x254] ss:$8 sps:$4 sm:$0xff]  }
 0x1d7   :  { %2480 = vmatprep.subr.bf16.mxu0 %v3017_v3 }
 0x1d8   :  { %1215 = vmatmul.mubr.bf16.gmra.mrb[4].mxu1 %v3607_v20  ;;  %v866_v63 = vmax.f32 %v853_v0, %v854_v58  ;;  %v2427_v58 = vld [vmem:[%s3782_s4] ss:$0 sm:$0xff] }
 0x1d9   :  { %1348 = vmatpush1.bf16.msra.mxu1 %v2941_v54  ;;  %1224 = vmatprep.mubr.bf16.mxu1 %v3109_v32 }
 0x1da   :  { %1349 = vmatprep.subr.bf16.mxu1 %v2946_v57  ;;  %v885_v27 = vadd.f32 %v3598_v5, %v866_v63  ;;  %2481 = vmatpush3.bf16.msra.mxu0 %v3018_v8  ;;  %v3020_v5 = vld [vmem:[%s3783_s5 + $0x30] sm:$0xff]  }
 0x1db   :  { %2482 = vmatprep.subr.bf16.mxu0 %v3019_v12 }
 0x1dc   :  { %v897_v11 = vmax.f32 %v885_v27, 0.0 }
 0x1dd   :  { %1350 = vmatpush1.bf16.msra.mxu1 %v2944_v29 }
 0x1de   :  { %1351 = vmatprep.subr.bf16.mxu1 %v2949_v7  ;;  %v3680_v10 = vpack.c.bf16 %v897_v11, %v896_v50  ;;  %2483 = vmatpush3.bf16.msra.mxu0 %v3020_v5 }
 0x1e0   :  { %1225 = vmatmul.mubr.bf16.gmra.mrb[8].mxu1 %v3615_v44 }
 0x1e1   :  { %1352 = vmatpush1.bf16.msra.mxu1 %v2947_v13  ;;  %1234 = vmatprep.mubr.bf16.mxu1 %v3109_v32 }
 0x1e2   :  { %1353 = vmatprep.subr.bf16.mxu1 %v2952_v14 }
 0x1e5   :  { %1354 = vmatpush1.bf16.msra.mxu1 %v2950_v49 }
 0x1e6   :  { %1355 = vmatprep.subr.bf16.mxu1 %v2955_v9 }
 0x1e8   :  { %1235 = vmatmul.mubr.bf16.gmra.mrb[12].mxu1 %v3623_v15 }
 0x1e9   :  { %1356 = vmatpush1.bf16.msra.mxu1 %v2953_v48  ;;  %1375 = vmatprep.mubr.bf16.mxu1 %v3109_v32  ;;  %v3024_v48 = vld [vmem:[%s3783_s5 + $0x80] sm:$0xff]  }
 0x1ea   :  { %1357 = vmatprep.subr.bf16.mxu1 %v2958_v16 }
 0x1ed   :  { %1358 = vmatpush1.bf16.msra.mxu1 %v2956_v61  ;;  %v3025_v61 = vld [vmem:[%s3783_s5 + $0xc8] sm:$0xff]  }
 0x1ee   :  { %1530 = vmatprep.subr.bf16.mxu1 %v2961_v2 }
 0x1f0   :  { %1376 = vmatmul.mubr.bf16.vlgmr.msra.gmra.mrb[0].mxu1 %v3607_v20  ;;  %v2971_v20 = vld [vmem:[#allocation2 + $0x1c0] ss:$8 sps:$4 sm:$0xff]  }
 0x1f1   :  { %1531 = vmatpush1.bf16.msra.mxu1 %v2959_v60  ;;  %1385 = vmatprep.mubr.bf16.mxu1 %v3109_v32 }
 0x1f2   :  { %1532 = vmatprep.subr.bf16.mxu1 %v2964_v17  ;;  %v3026_v17 = vld [vmem:[%s3783_s5 + $0x88] sm:$0xff]  }
 0x1f5   :  { %1533 = vmatpush1.bf16.msra.mxu1 %v2962_v1 }
 0x1f6   :  { %1534 = vmatprep.subr.bf16.mxu1 %v2967_v22  ;;  %v3027_v22 = vld [vmem:[%s3783_s5 + $0xd0] sm:$0xff]  }
 0x1f8   :  { %1386 = vmatmul.mubr.bf16.gmra.mrb[4].mxu1 %v3615_v44 }
 0x1f9   :  { %1535 = vmatpush1.bf16.msra.mxu1 %v2965_v23  ;;  %1395 = vmatprep.mubr.bf16.mxu1 %v3109_v32 }
 0x1fa   :  { %1536 = vmatprep.subr.bf16.mxu1 %v2970_v24 }
 0x1fd   :  { %1537 = vmatpush1.bf16.msra.mxu1 %v2968_v25 }
 0x1fe   :  { %1538 = vmatprep.subr.bf16.mxu1 %v2973_v26 }
 0x200   :  { %1396 = vmatmul.mubr.bf16.gmra.mrb[8].mxu1 %v3623_v15 }
 0x201   :  { %1539 = vmatpush1.bf16.msra.mxu1 %v2971_v20  ;;  %1405 = vmatprep.mubr.bf16.mxu1 %v3109_v32  ;;  %v3028_v20 = vld [vmem:[%s3783_s5 + $0x90] sm:$0xff]  }
 0x202   :  { %1540 = vmatprep.subr.bf16.mxu1 %v2976_v36  ;;  %v3029_v36 = vld [vmem:[%s3783_s5 + $0xd8] sm:$0xff]  }
 0x205   :  { %1541 = vmatpush1.bf16.msra.mxu1 %v2974_v28 }
 0x206   :  { %1542 = vmatprep.subr.bf16.mxu1 %v2979_v35 }
 0x208   :  { %1406 = vmatmul.mubr.bf16.gmra.mrb[12].mxu1 %v3646_v39 }
 0x209   :  { %1543 = vmatpush1.bf16.msra.mxu1 %v2977_v30  ;;  %1562 = vmatprep.mubr.bf16.mxu1 %v3109_v32  ;;  %v3030_v30 = vld [vmem:[%s3783_s5 + $0x98] sm:$0xff]  }
 0x20a   :  { %1544 = vmatprep.subr.bf16.mxu1 %v2982_v31  ;;  %v3031_v31 = vld [vmem:[%s3783_s5 + $0xe0] sm:$0xff]  }
 0x20d   :  { %1545 = vmatpush1.bf16.msra.mxu1 %v2980_v33 }
 0x20e   :  { %1717 = vmatprep.subr.bf16.mxu1 %v2985_v34 }
 0x210   :  { %1563 = vmatmul.mubr.bf16.vlgmr.msra.gmra.mrb[0].mxu1 %v3610_v53  ;;  %v2995_v53 = vld [vmem:[#allocation2 + $0x240] ss:$8 sps:$4 sm:$0xff]  }
 0x211   :  { %1718 = vmatpush1.bf16.msra.mxu1 %v2983_v52  ;;  %1572 = vmatprep.mubr.bf16.mxu1 %v3109_v32  ;;  %v3032_v52 = vld [vmem:[%s3783_s5 + $0xa0] sm:$0xff]  }
 0x212   :  { %1719 = vmatprep.subr.bf16.mxu1 %v2988_v37  ;;  %v3033_v37 = vld [vmem:[%s3783_s5 + $0xe8] sm:$0xff]  }
 0x215   :  { %1720 = vmatpush1.bf16.msra.mxu1 %v2986_v38  ;;  %v3034_v38 = vld [vmem:[%s3783_s5 + $0xa8] sm:$0xff]  }
 0x216   :  { %1721 = vmatprep.subr.bf16.mxu1 %v2991_v21  ;;  %v3035_v21 = vld [vmem:[%s3783_s5 + $0xf0] sm:$0xff]  }
 0x218   :  { %1573 = vmatmul.mubr.bf16.gmra.mrb[4].mxu1 %v3618_v6  ;;  %v3001_v6 = vld [vmem:[#allocation2 + $0x260] ss:$8 sps:$4 sm:$0xff]  }
 0x219   :  { %1722 = vmatpush1.bf16.msra.mxu1 %v2989_v19  ;;  %1582 = vmatprep.mubr.bf16.mxu1 %v3109_v32  ;;  %v3036_v19 = vld [vmem:[%s3783_s5 + $0xb0] sm:$0xff]  }
 0x21a   :  { %1723 = vmatprep.subr.bf16.mxu1 %v2994_v40 }
 0x21d   :  { %1724 = vmatpush1.bf16.msra.mxu1 %v2992_v41  ;;  %v3037_v41 = vld [vmem:[%s3783_s5 + $0xf8] sm:$0xff]  }
 0x21e   :  { %1725 = vmatprep.subr.bf16.mxu1 %v2997_v42  ;;  %v3038_v42 = vld [vmem:[%s3783_s5 + $0xb8] sm:$0xff]  }
 0x220   :  { %1583 = vmatmul.mubr.bf16.gmra.mrb[8].mxu1 %v3626_v18  ;;  %v3021_v18 = vld [vmem:[%s3783_s5 + $0x78] sm:$0xff]  }
 0x221   :  { %1726 = vmatpush1.bf16.msra.mxu1 %v2995_v53  ;;  %1592 = vmatprep.mubr.bf16.mxu1 %v3109_v32 }
 0x222   :  { %1727 = vmatprep.subr.bf16.mxu1 %v3000_v45  ;;  %2484 = vmatprep.subr.bf16.mxu0 %v3021_v18  ;;  %v3043_v18 = vld [vmem:[#allocation4 + $0x20] sm:$0xff]  }
 0x225   :  { %1728 = vmatpush1.bf16.msra.mxu1 %v2998_v4  ;;  %v3039_v4 = vld [vmem:[#allocation4] sm:$0xff]  }
 0x226   :  { %1729 = vmatprep.subr.bf16.mxu1 %v3003_v46  ;;  %v3110_v46 = vmov 0.0  }
 0x228   :  { %1593 = vmatmul.mubr.bf16.gmra.mrb[12].mxu1 %v3663_v59 }
 0x229   :  { %1730 = vmatpush1.bf16.msra.mxu1 %v3001_v6  ;;  %1749 = vmatprep.mubr.bf16.mxu1 %v3109_v32  ;;  %v3040_v6 = vld [vmem:[#allocation4 + $0x8] sm:$0xff]  }
 0x22a   :  { %1731 = vmatprep.subr.bf16.mxu1 %v3006_v47  ;;  %v3041_v47 = vld [vmem:[#allocation4 + $0x10] sm:$0xff]  }
 0x22d   :  { %1732 = vmatpush1.bf16.msra.mxu1 %v3004_v56  ;;  %v3042_v56 = vld [vmem:[#allocation4 + $0x18] sm:$0xff]  }
 0x22e   :  { %2523 = vmatprep.subr.bf16.mxu1 %v3110_v46 }
 0x230   :  { %1750 = vmatmul.mubr.bf16.vlgmr.msra.gmra.mrb[0].mxu1 %v3615_v44  ;;  %v3022_v44 = vld [vmem:[%s3783_s5 + $0x38] sm:$0xff]  }
 0x231   :  { %1759 = vmatprep.mubr.bf16.mxu1 %v3109_v32  ;;  %2485 = vmatpush3.bf16.msra.mxu0 %v3022_v44  ;;  %v3044_v44 = vld [vmem:[#allocation4 + $0x28] sm:$0xff]  }
 0x232   :  { %2524 = vmatpush3.bf16.msra.mxu1 %v3039_v4 }
 0x233   :  { %2525 = vmatprep.subr.bf16.mxu1 %v3110_v46 }
 0x236   :  { %2526 = vmatpush3.bf16.msra.mxu1 %v3040_v6 }
 0x237   :  { %2527 = vmatprep.subr.bf16.mxu1 %v3110_v46 }
 0x238   :  { %1760 = vmatmul.mubr.bf16.gmra.mrb[4].mxu1 %v3623_v15  ;;  %v3023_v15 = vld [vmem:[%s3783_s5 + $0xc0] sm:$0xff]  }
 0x239   :  { %1769 = vmatprep.mubr.bf16.mxu1 %v3109_v32  ;;  %2492 = vmatprep.subr.bf16.mxu0 %v3023_v15  ;;  %v3045_v15 = vld [vmem:[#allocation4 + $0x30] sm:$0xff]  }
 0x23a   :  { %2528 = vmatpush3.bf16.msra.mxu1 %v3041_v47 }
 0x23b   :  { %2529 = vmatprep.subr.bf16.mxu1 %v3110_v46 }
 0x23e   :  { %2530 = vmatpush3.bf16.msra.mxu1 %v3042_v56 }
 0x23f   :  { %2531 = vmatprep.subr.bf16.mxu1 %v3110_v46 }
 0x240   :  { %1770 = vmatmul.mubr.bf16.gmra.mrb[8].mxu1 %v3646_v39 }
 0x241   :  { %1779 = vmatprep.mubr.bf16.mxu1 %v3109_v32 }
 0x242   :  { %2532 = vmatpush3.bf16.msra.mxu1 %v3043_v18 }
 0x243   :  { %2533 = vmatprep.subr.bf16.mxu1 %v3110_v46 }
 0x246   :  { %2534 = vmatpush3.bf16.msra.mxu1 %v3044_v44 }
 0x247   :  { %2535 = vmatprep.subr.bf16.mxu1 %v3110_v46 }
 0x248   :  { %1780 = vmatmul.mubr.bf16.gmra.mrb[12].mxu1 %v3680_v10 }
 0x249   :  { %2539 = vmatprep.mubr.msk.bf16.mxu1 %vm3111_vm6, %v3110_v46 }
 0x24a   :  { %2536 = vmatpush3.bf16.msra.mxu1 %v3045_v15 }
 0x24b   :  { %2537 = vmatprep.subr.bf16.mxu1 %v3110_v46 }
 0x303   :  { %v1751_v39 = vpop.f32.mrb[0].mxu1 }
 0x304   :  { %v1753_v50 = vpop.f32.mrb[1].mxu1 }
 0x305   :  { %v1806_v32 = vmax.f32 %v1751_v39, %v1753_v50  ;;  %v1755_v0 = vpop.f32.mrb[2].mxu1  ;;  %v3046_v39 = vld [vmem:[#allocation4 + $0x38] sm:$0xff]  }
 0x306   :  { %v1757_v43 = vpop.f32.mrb[3].mxu1  ;;  %2538 = vmatpush3.bf16.msra.mxu1 %v3046_v39 }
 0x307   :  { %v1807_v51 = vmax.f32 %v1755_v0, %v1757_v43 }
 0x309   :  { %v1814_v54 = vmax.f32 %v1806_v32, %v1807_v51 }
 0x30b   :  { %v1761_v55 = vpop.f32.mrb[4].mxu1  ;;  %v1825_v29 = vadd.f32 %v2427_v58, %v1814_v54  ;;  %v2428_v54 = vld [vmem:[%s3784_s6] ss:$0 sm:$0xff] }
 0x30c   :  { %v1763_v57 = vpop.f32.mrb[5].mxu1 }
 0x30d   :  { %v1808_v59 = vmax.f32 %v1761_v55, %v1763_v57  ;;  %v1765_v62 = vpop.f32.mrb[6].mxu1  ;;  %v1829_v11 = vmax.f32 %v1825_v29, 0.0 }
 0x30e   :  { %v1767_v63 = vpop.f32.mrb[7].mxu1 }
 0x30f   :  { %v1809_v3 = vmax.f32 %v1765_v62, %v1767_v63  ;;  %v1833_v16 = vpack.c.bf16 %v1829_v11, %v1829_v11  ;;  %v2461_v11 = vld [vmem:[%s3786_s8] ss:$0 sm:$0xff] }
 0x311   :  { %v1815_v7 = vmax.f32 %v1808_v59, %v1809_v3 }
 0x313   :  { %v1826_v27 = vadd.f32 %v2427_v58, %v1815_v7  ;;  %v1771_v8 = vpop.f32.mrb[8].mxu1 }
 0x314   :  { %v1773_v12 = vpop.f32.mrb[9].mxu1 }
 0x315   :  { %v1810_v13 = vmax.f32 %v1771_v8, %v1773_v12  ;;  %v1775_v14 = vpop.f32.mrb[10].mxu1  ;;  %v1830_v10 = vmax.f32 %v1826_v27, 0.0  ;;  %v2293_v27 = vlaneseq }
 0x316   :  { %v1777_v5 = vpop.f32.mrb[11].mxu1 }
 0x317   :  { %v1811_v49 = vmax.f32 %v1775_v14, %v1777_v5  ;;  %v1834_v9 = vpack.c.bf16 %v1830_v10, %v1830_v10  ;;  %v2294_v8 = vand.u32 127, %v2293_v27 }
 0x319   :  { %v1816_v2 = vmax.f32 %v1810_v13, %v1811_v49  ;;  %2132 = vmatprep.mubr.bf16.mxu0 %v1834_v9  ;;  %vm2295_vm7 = vcmp.lt.s32.totalorder %v2294_v8, 10 }
 0x31a   :  { %2133 = vmatmul.mubr.bf16.vlgmr.msra.gmra.mrb[48].mxu0 %v1833_v16 }
 0x31b   :  { %2493 = vmatpush3.bf16.msra.mxu0 %v3024_v48  ;;  %v1781_v60 = vpop.f32.mrb[12].mxu1  ;;  %v1827_v40 = vadd.f32 %v2427_v58, %v1816_v2 }
 0x31c   :  { %v1783_v1 = vpop.f32.mrb[13].mxu1  ;;  %2494 = vmatprep.subr.bf16.mxu0 %v3025_v61 }
 0x31d   :  { %v1812_v23 = vmax.f32 %v1781_v60, %v1783_v1  ;;  %v1785_v24 = vpop.f32.mrb[14].mxu1  ;;  %v1831_v53 = vmax.f32 %v1827_v40, 0.0 }
 0x31e   :  { %v1787_v25 = vpop.f32.mrb[15].mxu1 }
 0x31f   :  { %v1813_v26 = vmax.f32 %v1785_v24, %v1787_v25  ;;  %2495 = vmatpush3.bf16.msra.mxu0 %v3026_v17  ;;  %v1835_v45 = vpack.c.bf16 %v1831_v53, %v1831_v53 }
 0x320   :  { %2496 = vmatprep.subr.bf16.mxu0 %v3027_v22 }
 0x321   :  { %v1817_v28 = vmax.f32 %v1812_v23, %v1813_v26 }
 0x323   :  { %v1828_v35 = vadd.f32 %v2427_v58, %v1817_v28  ;;  %2497 = vmatpush3.bf16.msra.mxu0 %v3028_v20 }
 0x324   :  { %2498 = vmatprep.subr.bf16.mxu0 %v3029_v36 }
 0x325   :  { %v1832_v33 = vmax.f32 %v1828_v35, 0.0 }
 0x327   :  { %2499 = vmatpush3.bf16.msra.mxu0 %v3030_v30  ;;  %v1836_v34 = vpack.c.bf16 %v1832_v33, %v1832_v33 }
 0x328   :  { %2500 = vmatprep.subr.bf16.mxu0 %v3031_v31 }
 0x329   :  { %2172 = vmatprep.mubr.bf16.mxu0 %v1836_v34 }
 0x32b   :  { %2501 = vmatpush3.bf16.msra.mxu0 %v3032_v52 }
 0x32c   :  { %2502 = vmatprep.subr.bf16.mxu0 %v3033_v37 }
 0x32f   :  { %2503 = vmatpush3.bf16.msra.mxu0 %v3034_v38 }
 0x330   :  { %2504 = vmatprep.subr.bf16.mxu0 %v3035_v21 }
 0x333   :  { %2505 = vmatpush3.bf16.msra.mxu0 %v3036_v19 }
 0x334   :  { %2506 = vmatprep.subr.bf16.mxu0 %v3037_v41 }
 0x337   :  { %2507 = vmatpush3.bf16.msra.mxu0 %v3038_v42 }
 0x33a   :  { %2173 = vmatmul.mubr.bf16.vlgmr.msra.gmra.mrb[52].mxu0 %v1835_v45 }
 0x3ed   :  { %v2486_v50 = vpop.f32.mrb[48].mxu0 }
 0x3ee   :  { %v2487_v32 = vpop.f32.mrb[49].mxu0 }
 0x3ef   :  { %v2488_v0 = vadd.f32 %v2487_v32, %v2486_v50  ;;  %v2489_v43 = vpop.f32.mrb[50].mxu0 }
 0x3f0   :  { %v2490_v51 = vpop.f32.mrb[51].mxu0 }
 0x3f1   :  { %v2135_v58 = vadd.f32 %v2488_v0, %v2428_v54 }
 0x40d   :  { %v2508_v55 = vpop.f32.mrb[52].mxu0 }
 0x40e   :  { %v2509_v57 = vpop.f32.mrb[53].mxu0 }
 0x40f   :  { %v2510_v59 = vadd.f32 %v2509_v57, %v2508_v55  ;;  %v2511_v62 = vpop.f32.mrb[54].mxu0 }
 0x410   :  { %v2512_v63 = vpop.f32.mrb[55].mxu0 }
 0x411   :  { %v2175_v3 = vadd.f32 %v2510_v59, %v2135_v58 }
 0x413   :  { %v2180_v29 = vmax.f32 %v2175_v3, 0.0 }
 0x415   :  { %v2181_v7 = vpack.c.bf16 %v2180_v29, %v2180_v29 }
 0x417   :  { %2540 = vmatmul.mubr.bf16.vlgmr.msra.gmra.mrb[16].mxu1 %v2181_v7 }
 0x4ea   :  { %v2287_v12 = vpop.f32.mrb[16].mxu1 }
 0x4eb   :  { %v2288_v13 = vadd.f32 %v2461_v11, %v2287_v12  ;;  %v2541_v14 = vpop.f32.mrb[17].mxu1 }
 0x4ec   :  { %v2290_v10 = vpop.f32.mrb[18].mxu1 }
 0x4ed   :  { %v2542_v5 = vpop.f32.mrb[19].mxu1  ;;  %v2296_v49 = vsel %vm2295_vm7, %v2288_v13, -1e+30 }
 0x4ee   :  { %2297 = vmax.xlane.f32.xlu0 %v2296_v49 }
 0x57b   :  { %v2298_v9 = vpop.xlane.xlu0 %2297 }
 0x57c   :  { %v2299_v48 = vsub.f32 %v2296_v49, %v2298_v9 }
 0x57e   :  { %v2300_v16 = vmul.f32 1.442695, %v2299_v48 }
 0x580   :  { %3047 = vpow2.f32 %v2300_v16 }
 0x58a   :  { %v3048_v61 = vpop.eup %3047 }
 0x58b   :  { %2302 = vadd.xlane.f32.xlu1 %v3048_v61 }
 0x618   :  { %v2303_v2 = vpop.xlane.xlu1 %2302 }
 0x619   :  { %3049 = vlog2.f32 %v2303_v2 }
 0x623   :  { %v3050_v60 = vpop.eup %3049 }
 0x624   :  { %v2305_v17 = vmul.f32 0.6931472, %v3050_v60 }
 0x626   :  { %v2306_v1 = vadd.f32 %v2305_v17, %v2298_v9 }
 0x628   :  { %v2307_v22 = vsub.f32 %v2296_v49, %v2306_v1 }
 0x62a   :  { %2308 = vst [vmem:[%s3787_s9] sm:$0xff] %v2307_v22 }
 0x62b   :  { %2313 = vsyncpa [#allocation3], 1 }
 0x62c   :  { %2314 = vsyncpa [#allocation5], 1 }

</bundles_post_ra>
